<compile_context>
chip_gen: v5e
topology: v5e:2x2
jax: 0.10.0
libtpu: 0.0.40
codegen_flags: <defaults>
</compile_context>

<pallas_src>
import functools
import math

import jax
import jax.numpy as jnp
from jax.experimental import pallas as pl
from jax.experimental.pallas import tpu as pltpu


def seq2seq_kernel(T_in, T_out, B, H,
                   x_ref, wih_e_ref, whh_e_ref, b_e_ref,
                   wih_d_ref, whh_d_ref, b_d_ref,
                   wlin_ref, blin_ref,
                   y_ref):
    f32 = jnp.float32
    bf16 = jnp.bfloat16

    whh_e = whh_e_ref[...]          # (H, 4H) bf16
    whh_d = whh_d_ref[...]          # (H, 4H) bf16
    wlin = wlin_ref[...]            # (T_out*H, N_pad) bf16

    def cell(h, c, pre, whh):
        # Gates stacked along lanes in order (i, f, g, o): one MXU push/step.
        z = pre + jnp.dot(h.astype(bf16), whh, preferred_element_type=f32)
        # One sigmoid + one tanh over the full 128-lane z, then slice.
        sig_z = jax.nn.sigmoid(z)
        tanh_z = jnp.tanh(z)
        i = sig_z[:, 0 * H:1 * H]
        f = sig_z[:, 1 * H:2 * H]
        g = tanh_z[:, 2 * H:3 * H]
        o = sig_z[:, 3 * H:4 * H]
        c_new = f * c + i * g
        h_new = o * jnp.tanh(c_new)
        return h_new, c_new

    # Encoder input projection for the whole sequence, off the serial chain.
    # x_ref is time-major flattened: row t*B + b.  Bias hoisted out of loop.
    x_proj = (jnp.dot(x_ref[...], wih_e_ref[...], preferred_element_type=f32)
              + b_e_ref[...])                                   # (T_in*B, 4H)

    h = jnp.zeros((B, H), f32)
    c = jnp.zeros((B, H), f32)

    # ---------------- encoder LSTM (lstm1), fully unrolled ------------------
    for t in range(T_in):
        h, c = cell(h, c, x_proj[t * B:(t + 1) * B, :], whh_e)

    # Decoder input == time_repeat(encoder last hidden, T_out), so its input
    # projection (+ merged bias) is constant across decoder steps.
    dec_pre = (jnp.dot(h.astype(bf16), wih_d_ref[...],
                       preferred_element_type=f32)
               + b_d_ref[...])                                  # (B, 4H)

    # ------------- decoder LSTM (lstm2) with the Linear folded in -----------
    N_pad = y_ref.shape[1]
    y_acc = jnp.zeros((B, N_pad), f32)
    for t in range(T_out):
        h, c = cell(h, c, dec_pre, whh_d)
        # Per-step partial of the flattened Linear; off the recurrence chain.
        y_acc = y_acc + jnp.dot(h.astype(bf16), wlin[t * H:(t + 1) * H, :],
                                preferred_element_type=f32)

    # Single lane-dense, unmasked store (N_pad is a multiple of 128).
    y_ref[...] = y_acc + blin_ref[...]


def seq2seq_forward(x, params, output_shape, hidden_size):
    B, T_in, F_in = x.shape
    T_out, F_out = output_shape
    H = hidden_size
    N = T_out * F_out
    N_pad = pl.cdiv(N, 128) * 128
    B_pad = max(8, pl.cdiv(B, 8) * 8)        # f32 sublane tile
    bf16 = jnp.bfloat16

    # Pad batch to the sublane tile, then time-major flatten: row t*B_pad + b.
    x_pad = jnp.zeros((B_pad, T_in, F_in), jnp.float32).at[:B].set(
        x.astype(jnp.float32))
    x2d = jnp.transpose(x_pad, (1, 0, 2)).reshape(T_in * B_pad, F_in).astype(bf16)

    wlin_p = (jnp.zeros((T_out * H, N_pad), jnp.float32)
              .at[:, :N].set(params["wlin"])).astype(bf16)
    blin_p = jnp.zeros((1, N_pad), jnp.float32).at[:, :N].set(params["blin"])

    in_arrays = [x2d,
                 params["wih_e"].astype(bf16), params["whh_e"].astype(bf16),
                 params["b_e"],
                 params["wih_d"].astype(bf16), params["whh_d"].astype(bf16),
                 params["b_d"],
                 wlin_p, blin_p]

    def full_spec(shape):
        nd = len(shape)
        return pl.BlockSpec(shape, lambda i, _nd=nd: (0,) * _nd)

    kernel = functools.partial(seq2seq_kernel, T_in, T_out, B_pad, H)

    y_pad = pl.pallas_call(
        kernel,
        out_shape=jax.ShapeDtypeStruct((B_pad, N_pad), jnp.float32),
        grid_spec=pltpu.PrefetchScalarGridSpec(
            num_scalar_prefetch=0,
            grid=(1,),
            in_specs=[full_spec(a.shape) for a in in_arrays],
            out_specs=full_spec((B_pad, N_pad))),
        compiler_params=pltpu.CompilerParams(
            dimension_semantics=("arbitrary",)),
    )(*in_arrays)

    return y_pad[:B, :N].reshape(B, T_out, F_out)


def init_params(key, input_shape, output_shape, H):
    T_in, F_in = input_shape
    T_out, F_out = output_shape
    ks = jax.random.split(key, 8)
    k_lstm = 1.0 / math.sqrt(H)
    k_lin = 1.0 / math.sqrt(T_out * H)

    def u(k, shape, scale):
        return jax.random.uniform(k, shape, jnp.float32, -scale, scale)

    return dict(
        wih_e=u(ks[0], (F_in, 4 * H), k_lstm),
        whh_e=u(ks[1], (H, 4 * H), k_lstm),
        b_e=u(ks[2], (1, 4 * H), k_lstm),       # merged b_ih + b_hh
        wih_d=u(ks[3], (H, 4 * H), k_lstm),
        whh_d=u(ks[4], (H, 4 * H), k_lstm),
        b_d=u(ks[5], (1, 4 * H), k_lstm),       # merged b_ih + b_hh
        wlin=u(ks[6], (T_out * H, T_out * F_out), k_lin),
        blin=u(ks[7], (1, T_out * F_out), k_lin),
    )


def reference_forward(x, params, output_shape, H):
    """Pure-JAX f32 reference matching Seq2Seq3.forward semantics."""
    B, T_in, F_in = x.shape
    T_out, F_out = output_shape

    def cell(h, c, x_t, wih, whh, b):
        z = x_t @ wih + h @ whh + b
        i = jax.nn.sigmoid(z[:, 0 * H:1 * H])
        f = jax.nn.sigmoid(z[:, 1 * H:2 * H])
        g = jnp.tanh(z[:, 2 * H:3 * H])
        o = jax.nn.sigmoid(z[:, 3 * H:4 * H])
        c_new = f * c + i * g
        return o * jnp.tanh(c_new), c_new

    h = jnp.zeros((B, H), jnp.float32)
    c = jnp.zeros((B, H), jnp.float32)
    for t in range(T_in):                                  # lstm1
        h, c = cell(h, c, x[:, t, :],
                    params["wih_e"], params["whh_e"], params["b_e"])
    enc_out = h                                            # last output
    outs = []
    for _ in range(T_out):                                 # lstm2 on repeated enc_out
        h, c = cell(h, c, enc_out,
                    params["wih_d"], params["whh_d"], params["b_d"])
        outs.append(h)
    dec = jnp.stack(outs, axis=1).reshape(B, T_out * H)    # flatten (T_out, H)
    y = dec @ params["wlin"] + params["blin"]              # lin
    return y.reshape(B, T_out, F_out)


if __name__ == "__main__":
    B = 2
    input_shape = (10, 6)     # (T_in, F_in)
    output_shape = (8, 5)     # (T_out, F_out)
    hidden = 32               # 4H = 128 -> one dense lane tile per gate set

    key = jax.random.PRNGKey(0)
    kx, kp = jax.random.split(key)
    x = jax.random.normal(kx, (B,) + input_shape, jnp.float32)
    params = init_params(kp, input_shape, output_shape, hidden)

    y = seq2seq_forward(x, params, output_shape, hidden)
    y = jax.block_until_ready(y)

    y_ref = reference_forward(x, params, output_shape, hidden)
    assert y.shape == (B,) + output_shape
    assert jnp.allclose(y, y_ref, atol=1e-2, rtol=1e-2), "kernel/reference mismatch"

    print("KERNEL_OK")
</pallas_src>

<mosaic_0001>
module attributes {stable_mosaic.version = 11 : i64} {
  func.func @seq2seq_kernel(%arg0: i32, %arg1: memref<80x6xbf16, #tpu.memory_space<vmem>>, %arg2: memref<6x128xbf16, #tpu.memory_space<vmem>>, %arg3: memref<32x128xbf16, #tpu.memory_space<vmem>>, %arg4: memref<1x128xf32, #tpu.memory_space<vmem>>, %arg5: memref<32x128xbf16, #tpu.memory_space<vmem>>, %arg6: memref<32x128xbf16, #tpu.memory_space<vmem>>, %arg7: memref<1x128xf32, #tpu.memory_space<vmem>>, %arg8: memref<256x128xbf16, #tpu.memory_space<vmem>>, %arg9: memref<1x128xf32, #tpu.memory_space<vmem>>, %arg10: memref<8x128xf32, #tpu.memory_space<vmem>>) attributes {dimension_semantics = [#tpu.dimension_semantics<arbitrary>], iteration_bounds = array<i64: 1>, scalar_prefetch = 0 : i64, scratch_operands = 0 : i64, tpu.core_type = #tpu.core_type<tc>, window_params = [{pipeline_mode = #tpu.pipeline_mode<synchronous>, transform_indices = @transform_0, window_bounds = array<i64: 80, 6>}, {pipeline_mode = #tpu.pipeline_mode<synchronous>, transform_indices = @transform_1, window_bounds = array<i64: 6, 128>}, {pipeline_mode = #tpu.pipeline_mode<synchronous>, transform_indices = @transform_2, window_bounds = array<i64: 32, 128>}, {pipeline_mode = #tpu.pipeline_mode<synchronous>, transform_indices = @transform_3, window_bounds = array<i64: 1, 128>}, {pipeline_mode = #tpu.pipeline_mode<synchronous>, transform_indices = @transform_4, window_bounds = array<i64: 32, 128>}, {pipeline_mode = #tpu.pipeline_mode<synchronous>, transform_indices = @transform_5, window_bounds = array<i64: 32, 128>}, {pipeline_mode = #tpu.pipeline_mode<synchronous>, transform_indices = @transform_6, window_bounds = array<i64: 1, 128>}, {pipeline_mode = #tpu.pipeline_mode<synchronous>, transform_indices = @transform_7, window_bounds = array<i64: 256, 128>}, {pipeline_mode = #tpu.pipeline_mode<synchronous>, transform_indices = @transform_8, window_bounds = array<i64: 1, 128>}, {pipeline_mode = #tpu.pipeline_mode<synchronous>, transform_indices = @transform_9, window_bounds = array<i64: 8, 128>}]} {
    %c0 = arith.constant 0 : index
    %c0_0 = arith.constant 0 : index
    %0 = vector.load %arg3[%c0, %c0_0] : memref<32x128xbf16, #tpu.memory_space<vmem>>, vector<32x128xbf16>
    %c0_1 = arith.constant 0 : index
    %c0_2 = arith.constant 0 : index
    %1 = vector.load %arg6[%c0_1, %c0_2] : memref<32x128xbf16, #tpu.memory_space<vmem>>, vector<32x128xbf16>
    %c0_3 = arith.constant 0 : index
    %c0_4 = arith.constant 0 : index
    %2 = vector.load %arg8[%c0_3, %c0_4] : memref<256x128xbf16, #tpu.memory_space<vmem>>, vector<256x128xbf16>
    %c0_5 = arith.constant 0 : index
    %c0_6 = arith.constant 0 : index
    %3 = vector.load %arg1[%c0_5, %c0_6] : memref<80x6xbf16, #tpu.memory_space<vmem>>, vector<80x6xbf16>
    %c0_7 = arith.constant 0 : index
    %c0_8 = arith.constant 0 : index
    %4 = vector.load %arg2[%c0_7, %c0_8] : memref<6x128xbf16, #tpu.memory_space<vmem>>, vector<6x128xbf16>
    %cst = arith.constant dense<0.000000e+00> : vector<80x128xf32>
    %5 = tpu.matmul %3, %4, %cst {dimension_numbers = #tpu.dot_dimension_numbers<[1], [0], [0], [1], [0, 0, 1, 1], [], []>} : vector<80x6xbf16>, vector<6x128xbf16>, vector<80x128xf32> -> vector<80x128xf32>
    %c0_9 = arith.constant 0 : index
    %c0_10 = arith.constant 0 : index
    %6 = vector.load %arg4[%c0_9, %c0_10] : memref<1x128xf32, #tpu.memory_space<vmem>>, vector<1x128xf32>
    %7 = vector.broadcast %6 : vector<1x128xf32> to vector<80x128xf32>
    %8 = arith.addf %5, %7 : vector<80x128xf32>
    %cst_11 = arith.constant 0.000000e+00 : f32
    %9 = vector.broadcast %cst_11 : f32 to vector<8x32xf32>
    %cst_12 = arith.constant 0.000000e+00 : f32
    %10 = vector.broadcast %cst_12 : f32 to vector<8x32xf32>
    %11 = vector.extract_strided_slice %8 {offsets = [0, 0], sizes = [8, 128], strides = [1, 1]} : vector<80x128xf32> to vector<8x128xf32>
    %12 = arith.truncf %9 : vector<8x32xf32> to vector<8x32xbf16>
    %cst_13 = arith.constant dense<0.000000e+00> : vector<8x128xf32>
    %13 = tpu.matmul %12, %0, %cst_13 {dimension_numbers = #tpu.dot_dimension_numbers<[1], [0], [0], [1], [0, 0, 1, 1], [], []>} : vector<8x32xbf16>, vector<32x128xbf16>, vector<8x128xf32> -> vector<8x128xf32>
    %14 = arith.addf %11, %13 : vector<8x128xf32>
    %15 = arith.negf %14 : vector<8x128xf32>
    %16 = math.exp %15 : vector<8x128xf32>
    %cst_14 = arith.constant 1.000000e+00 : f32
    %17 = vector.broadcast %cst_14 : f32 to vector<8x128xf32>
    %18 = arith.addf %17, %16 : vector<8x128xf32>
    %19 = arith.divf %17, %18 : vector<8x128xf32>
    %20 = math.tanh %14 : vector<8x128xf32>
    %21 = vector.extract_strided_slice %19 {offsets = [0, 0], sizes = [8, 32], strides = [1, 1]} : vector<8x128xf32> to vector<8x32xf32>
    %22 = vector.extract_strided_slice %19 {offsets = [0, 32], sizes = [8, 32], strides = [1, 1]} : vector<8x128xf32> to vector<8x32xf32>
    %23 = vector.extract_strided_slice %20 {offsets = [0, 64], sizes = [8, 32], strides = [1, 1]} : vector<8x128xf32> to vector<8x32xf32>
    %24 = vector.extract_strided_slice %19 {offsets = [0, 96], sizes = [8, 32], strides = [1, 1]} : vector<8x128xf32> to vector<8x32xf32>
    %25 = arith.mulf %22, %10 : vector<8x32xf32>
    %26 = arith.mulf %21, %23 : vector<8x32xf32>
    %27 = arith.addf %25, %26 : vector<8x32xf32>
    %28 = math.tanh %27 : vector<8x32xf32>
    %29 = arith.mulf %24, %28 : vector<8x32xf32>
    %30 = vector.extract_strided_slice %8 {offsets = [8, 0], sizes = [8, 128], strides = [1, 1]} : vector<80x128xf32> to vector<8x128xf32>
    %31 = arith.truncf %29 : vector<8x32xf32> to vector<8x32xbf16>
    %cst_15 = arith.constant dense<0.000000e+00> : vector<8x128xf32>
    %32 = tpu.matmul %31, %0, %cst_15 {dimension_numbers = #tpu.dot_dimension_numbers<[1], [0], [0], [1], [0, 0, 1, 1], [], []>} : vector<8x32xbf16>, vector<32x128xbf16>, vector<8x128xf32> -> vector<8x128xf32>
    %33 = arith.addf %30, %32 : vector<8x128xf32>
    %34 = arith.negf %33 : vector<8x128xf32>
    %35 = math.exp %34 : vector<8x128xf32>
    %cst_16 = arith.constant 1.000000e+00 : f32
    %36 = vector.broadcast %cst_16 : f32 to vector<8x128xf32>
    %37 = arith.addf %36, %35 : vector<8x128xf32>
    %38 = arith.divf %36, %37 : vector<8x128xf32>
    %39 = math.tanh %33 : vector<8x128xf32>
    %40 = vector.extract_strided_slice %38 {offsets = [0, 0], sizes = [8, 32], strides = [1, 1]} : vector<8x128xf32> to vector<8x32xf32>
    %41 = vector.extract_strided_slice %38 {offsets = [0, 32], sizes = [8, 32], strides = [1, 1]} : vector<8x128xf32> to vector<8x32xf32>
    %42 = vector.extract_strided_slice %39 {offsets = [0, 64], sizes = [8, 32], strides = [1, 1]} : vector<8x128xf32> to vector<8x32xf32>
    %43 = vector.extract_strided_slice %38 {offsets = [0, 96], sizes = [8, 32], strides = [1, 1]} : vector<8x128xf32> to vector<8x32xf32>
    %44 = arith.mulf %41, %27 : vector<8x32xf32>
    %45 = arith.mulf %40, %42 : vector<8x32xf32>
    %46 = arith.addf %44, %45 : vector<8x32xf32>
    %47 = math.tanh %46 : vector<8x32xf32>
    %48 = arith.mulf %43, %47 : vector<8x32xf32>
    %49 = vector.extract_strided_slice %8 {offsets = [16, 0], sizes = [8, 128], strides = [1, 1]} : vector<80x128xf32> to vector<8x128xf32>
    %50 = arith.truncf %48 : vector<8x32xf32> to vector<8x32xbf16>
    %cst_17 = arith.constant dense<0.000000e+00> : vector<8x128xf32>
    %51 = tpu.matmul %50, %0, %cst_17 {dimension_numbers = #tpu.dot_dimension_numbers<[1], [0], [0], [1], [0, 0, 1, 1], [], []>} : vector<8x32xbf16>, vector<32x128xbf16>, vector<8x128xf32> -> vector<8x128xf32>
    %52 = arith.addf %49, %51 : vector<8x128xf32>
    %53 = arith.negf %52 : vector<8x128xf32>
    %54 = math.exp %53 : vector<8x128xf32>
    %cst_18 = arith.constant 1.000000e+00 : f32
    %55 = vector.broadcast %cst_18 : f32 to vector<8x128xf32>
    %56 = arith.addf %55, %54 : vector<8x128xf32>
    %57 = arith.divf %55, %56 : vector<8x128xf32>
    %58 = math.tanh %52 : vector<8x128xf32>
    %59 = vector.extract_strided_slice %57 {offsets = [0, 0], sizes = [8, 32], strides = [1, 1]} : vector<8x128xf32> to vector<8x32xf32>
    %60 = vector.extract_strided_slice %57 {offsets = [0, 32], sizes = [8, 32], strides = [1, 1]} : vector<8x128xf32> to vector<8x32xf32>
    %61 = vector.extract_strided_slice %58 {offsets = [0, 64], sizes = [8, 32], strides = [1, 1]} : vector<8x128xf32> to vector<8x32xf32>
    %62 = vector.extract_strided_slice %57 {offsets = [0, 96], sizes = [8, 32], strides = [1, 1]} : vector<8x128xf32> to vector<8x32xf32>
    %63 = arith.mulf %60, %46 : vector<8x32xf32>
    %64 = arith.mulf %59, %61 : vector<8x32xf32>
    %65 = arith.addf %63, %64 : vector<8x32xf32>
    %66 = math.tanh %65 : vector<8x32xf32>
    %67 = arith.mulf %62, %66 : vector<8x32xf32>
    %68 = vector.extract_strided_slice %8 {offsets = [24, 0], sizes = [8, 128], strides = [1, 1]} : vector<80x128xf32> to vector<8x128xf32>
    %69 = arith.truncf %67 : vector<8x32xf32> to vector<8x32xbf16>
    %cst_19 = arith.constant dense<0.000000e+00> : vector<8x128xf32>
    %70 = tpu.matmul %69, %0, %cst_19 {dimension_numbers = #tpu.dot_dimension_numbers<[1], [0], [0], [1], [0, 0, 1, 1], [], []>} : vector<8x32xbf16>, vector<32x128xbf16>, vector<8x128xf32> -> vector<8x128xf32>
    %71 = arith.addf %68, %70 : vector<8x128xf32>
    %72 = arith.negf %71 : vector<8x128xf32>
    %73 = math.exp %72 : vector<8x128xf32>
    %cst_20 = arith.constant 1.000000e+00 : f32
    %74 = vector.broadcast %cst_20 : f32 to vector<8x128xf32>
    %75 = arith.addf %74, %73 : vector<8x128xf32>
    %76 = arith.divf %74, %75 : vector<8x128xf32>
    %77 = math.tanh %71 : vector<8x128xf32>
    %78 = vector.extract_strided_slice %76 {offsets = [0, 0], sizes = [8, 32], strides = [1, 1]} : vector<8x128xf32> to vector<8x32xf32>
    %79 = vector.extract_strided_slice %76 {offsets = [0, 32], sizes = [8, 32], strides = [1, 1]} : vector<8x128xf32> to vector<8x32xf32>
    %80 = vector.extract_strided_slice %77 {offsets = [0, 64], sizes = [8, 32], strides = [1, 1]} : vector<8x128xf32> to vector<8x32xf32>
    %81 = vector.extract_strided_slice %76 {offsets = [0, 96], sizes = [8, 32], strides = [1, 1]} : vector<8x128xf32> to vector<8x32xf32>
    %82 = arith.mulf %79, %65 : vector<8x32xf32>
    %83 = arith.mulf %78, %80 : vector<8x32xf32>
    %84 = arith.addf %82, %83 : vector<8x32xf32>
    %85 = math.tanh %84 : vector<8x32xf32>
    %86 = arith.mulf %81, %85 : vector<8x32xf32>
    %87 = vector.extract_strided_slice %8 {offsets = [32, 0], sizes = [8, 128], strides = [1, 1]} : vector<80x128xf32> to vector<8x128xf32>
    %88 = arith.truncf %86 : vector<8x32xf32> to vector<8x32xbf16>
    %cst_21 = arith.constant dense<0.000000e+00> : vector<8x128xf32>
    %89 = tpu.matmul %88, %0, %cst_21 {dimension_numbers = #tpu.dot_dimension_numbers<[1], [0], [0], [1], [0, 0, 1, 1], [], []>} : vector<8x32xbf16>, vector<32x128xbf16>, vector<8x128xf32> -> vector<8x128xf32>
    %90 = arith.addf %87, %89 : vector<8x128xf32>
    %91 = arith.negf %90 : vector<8x128xf32>
    %92 = math.exp %91 : vector<8x128xf32>
    %cst_22 = arith.constant 1.000000e+00 : f32
    %93 = vector.broadcast %cst_22 : f32 to vector<8x128xf32>
    %94 = arith.addf %93, %92 : vector<8x128xf32>
    %95 = arith.divf %93, %94 : vector<8x128xf32>
    %96 = math.tanh %90 : vector<8x128xf32>
    %97 = vector.extract_strided_slice %95 {offsets = [0, 0], sizes = [8, 32], strides = [1, 1]} : vector<8x128xf32> to vector<8x32xf32>
    %98 = vector.extract_strided_slice %95 {offsets = [0, 32], sizes = [8, 32], strides = [1, 1]} : vector<8x128xf32> to vector<8x32xf32>
    %99 = vector.extract_strided_slice %96 {offsets = [0, 64], sizes = [8, 32], strides = [1, 1]} : vector<8x128xf32> to vector<8x32xf32>
    %100 = vector.extract_strided_slice %95 {offsets = [0, 96], sizes = [8, 32], strides = [1, 1]} : vector<8x128xf32> to vector<8x32xf32>
    %101 = arith.mulf %98, %84 : vector<8x32xf32>
    %102 = arith.mulf %97, %99 : vector<8x32xf32>
    %103 = arith.addf %101, %102 : vector<8x32xf32>
    %104 = math.tanh %103 : vector<8x32xf32>
    %105 = arith.mulf %100, %104 : vector<8x32xf32>
    %106 = vector.extract_strided_slice %8 {offsets = [40, 0], sizes = [8, 128], strides = [1, 1]} : vector<80x128xf32> to vector<8x128xf32>
    %107 = arith.truncf %105 : vector<8x32xf32> to vector<8x32xbf16>
    %cst_23 = arith.constant dense<0.000000e+00> : vector<8x128xf32>
    %108 = tpu.matmul %107, %0, %cst_23 {dimension_numbers = #tpu.dot_dimension_numbers<[1], [0], [0], [1], [0, 0, 1, 1], [], []>} : vector<8x32xbf16>, vector<32x128xbf16>, vector<8x128xf32> -> vector<8x128xf32>
    %109 = arith.addf %106, %108 : vector<8x128xf32>
    %110 = arith.negf %109 : vector<8x128xf32>
    %111 = math.exp %110 : vector<8x128xf32>
    %cst_24 = arith.constant 1.000000e+00 : f32
    %112 = vector.broadcast %cst_24 : f32 to vector<8x128xf32>
    %113 = arith.addf %112, %111 : vector<8x128xf32>
    %114 = arith.divf %112, %113 : vector<8x128xf32>
    %115 = math.tanh %109 : vector<8x128xf32>
    %116 = vector.extract_strided_slice %114 {offsets = [0, 0], sizes = [8, 32], strides = [1, 1]} : vector<8x128xf32> to vector<8x32xf32>
    %117 = vector.extract_strided_slice %114 {offsets = [0, 32], sizes = [8, 32], strides = [1, 1]} : vector<8x128xf32> to vector<8x32xf32>
    %118 = vector.extract_strided_slice %115 {offsets = [0, 64], sizes = [8, 32], strides = [1, 1]} : vector<8x128xf32> to vector<8x32xf32>
    %119 = vector.extract_strided_slice %114 {offsets = [0, 96], sizes = [8, 32], strides = [1, 1]} : vector<8x128xf32> to vector<8x32xf32>
    %120 = arith.mulf %117, %103 : vector<8x32xf32>
    %121 = arith.mulf %116, %118 : vector<8x32xf32>
    %122 = arith.addf %120, %121 : vector<8x32xf32>
    %123 = math.tanh %122 : vector<8x32xf32>
    %124 = arith.mulf %119, %123 : vector<8x32xf32>
    %125 = vector.extract_strided_slice %8 {offsets = [48, 0], sizes = [8, 128], strides = [1, 1]} : vector<80x128xf32> to vector<8x128xf32>
    %126 = arith.truncf %124 : vector<8x32xf32> to vector<8x32xbf16>
    %cst_25 = arith.constant dense<0.000000e+00> : vector<8x128xf32>
    %127 = tpu.matmul %126, %0, %cst_25 {dimension_numbers = #tpu.dot_dimension_numbers<[1], [0], [0], [1], [0, 0, 1, 1], [], []>} : vector<8x32xbf16>, vector<32x128xbf16>, vector<8x128xf32> -> vector<8x128xf32>
    %128 = arith.addf %125, %127 : vector<8x128xf32>
    %129 = arith.negf %128 : vector<8x128xf32>
    %130 = math.exp %129 : vector<8x128xf32>
    %cst_26 = arith.constant 1.000000e+00 : f32
    %131 = vector.broadcast %cst_26 : f32 to vector<8x128xf32>
    %132 = arith.addf %131, %130 : vector<8x128xf32>
    %133 = arith.divf %131, %132 : vector<8x128xf32>
    %134 = math.tanh %128 : vector<8x128xf32>
    %135 = vector.extract_strided_slice %133 {offsets = [0, 0], sizes = [8, 32], strides = [1, 1]} : vector<8x128xf32> to vector<8x32xf32>
    %136 = vector.extract_strided_slice %133 {offsets = [0, 32], sizes = [8, 32], strides = [1, 1]} : vector<8x128xf32> to vector<8x32xf32>
    %137 = vector.extract_strided_slice %134 {offsets = [0, 64], sizes = [8, 32], strides = [1, 1]} : vector<8x128xf32> to vector<8x32xf32>
    %138 = vector.extract_strided_slice %133 {offsets = [0, 96], sizes = [8, 32], strides = [1, 1]} : vector<8x128xf32> to vector<8x32xf32>
    %139 = arith.mulf %136, %122 : vector<8x32xf32>
    %140 = arith.mulf %135, %137 : vector<8x32xf32>
    %141 = arith.addf %139, %140 : vector<8x32xf32>
    %142 = math.tanh %141 : vector<8x32xf32>
    %143 = arith.mulf %138, %142 : vector<8x32xf32>
    %144 = vector.extract_strided_slice %8 {offsets = [56, 0], sizes = [8, 128], strides = [1, 1]} : vector<80x128xf32> to vector<8x128xf32>
    %145 = arith.truncf %143 : vector<8x32xf32> to vector<8x32xbf16>
    %cst_27 = arith.constant dense<0.000000e+00> : vector<8x128xf32>
    %146 = tpu.matmul %145, %0, %cst_27 {dimension_numbers = #tpu.dot_dimension_numbers<[1], [0], [0], [1], [0, 0, 1, 1], [], []>} : vector<8x32xbf16>, vector<32x128xbf16>, vector<8x128xf32> -> vector<8x128xf32>
    %147 = arith.addf %144, %146 : vector<8x128xf32>
    %148 = arith.negf %147 : vector<8x128xf32>
    %149 = math.exp %148 : vector<8x128xf32>
    %cst_28 = arith.constant 1.000000e+00 : f32
    %150 = vector.broadcast %cst_28 : f32 to vector<8x128xf32>
    %151 = arith.addf %150, %149 : vector<8x128xf32>
    %152 = arith.divf %150, %151 : vector<8x128xf32>
    %153 = math.tanh %147 : vector<8x128xf32>
    %154 = vector.extract_strided_slice %152 {offsets = [0, 0], sizes = [8, 32], strides = [1, 1]} : vector<8x128xf32> to vector<8x32xf32>
    %155 = vector.extract_strided_slice %152 {offsets = [0, 32], sizes = [8, 32], strides = [1, 1]} : vector<8x128xf32> to vector<8x32xf32>
    %156 = vector.extract_strided_slice %153 {offsets = [0, 64], sizes = [8, 32], strides = [1, 1]} : vector<8x128xf32> to vector<8x32xf32>
    %157 = vector.extract_strided_slice %152 {offsets = [0, 96], sizes = [8, 32], strides = [1, 1]} : vector<8x128xf32> to vector<8x32xf32>
    %158 = arith.mulf %155, %141 : vector<8x32xf32>
    %159 = arith.mulf %154, %156 : vector<8x32xf32>
    %160 = arith.addf %158, %159 : vector<8x32xf32>
    %161 = math.tanh %160 : vector<8x32xf32>
    %162 = arith.mulf %157, %161 : vector<8x32xf32>
    %163 = vector.extract_strided_slice %8 {offsets = [64, 0], sizes = [8, 128], strides = [1, 1]} : vector<80x128xf32> to vector<8x128xf32>
    %164 = arith.truncf %162 : vector<8x32xf32> to vector<8x32xbf16>
    %cst_29 = arith.constant dense<0.000000e+00> : vector<8x128xf32>
    %165 = tpu.matmul %164, %0, %cst_29 {dimension_numbers = #tpu.dot_dimension_numbers<[1], [0], [0], [1], [0, 0, 1, 1], [], []>} : vector<8x32xbf16>, vector<32x128xbf16>, vector<8x128xf32> -> vector<8x128xf32>
    %166 = arith.addf %163, %165 : vector<8x128xf32>
    %167 = arith.negf %166 : vector<8x128xf32>
    %168 = math.exp %167 : vector<8x128xf32>
    %cst_30 = arith.constant 1.000000e+00 : f32
    %169 = vector.broadcast %cst_30 : f32 to vector<8x128xf32>
    %170 = arith.addf %169, %168 : vector<8x128xf32>
    %171 = arith.divf %169, %170 : vector<8x128xf32>
    %172 = math.tanh %166 : vector<8x128xf32>
    %173 = vector.extract_strided_slice %171 {offsets = [0, 0], sizes = [8, 32], strides = [1, 1]} : vector<8x128xf32> to vector<8x32xf32>
    %174 = vector.extract_strided_slice %171 {offsets = [0, 32], sizes = [8, 32], strides = [1, 1]} : vector<8x128xf32> to vector<8x32xf32>
    %175 = vector.extract_strided_slice %172 {offsets = [0, 64], sizes = [8, 32], strides = [1, 1]} : vector<8x128xf32> to vector<8x32xf32>
    %176 = vector.extract_strided_slice %171 {offsets = [0, 96], sizes = [8, 32], strides = [1, 1]} : vector<8x128xf32> to vector<8x32xf32>
    %177 = arith.mulf %174, %160 : vector<8x32xf32>
    %178 = arith.mulf %173, %175 : vector<8x32xf32>
    %179 = arith.addf %177, %178 : vector<8x32xf32>
    %180 = math.tanh %179 : vector<8x32xf32>
    %181 = arith.mulf %176, %180 : vector<8x32xf32>
    %182 = vector.extract_strided_slice %8 {offsets = [72, 0], sizes = [8, 128], strides = [1, 1]} : vector<80x128xf32> to vector<8x128xf32>
    %183 = arith.truncf %181 : vector<8x32xf32> to vector<8x32xbf16>
    %cst_31 = arith.constant dense<0.000000e+00> : vector<8x128xf32>
    %184 = tpu.matmul %183, %0, %cst_31 {dimension_numbers = #tpu.dot_dimension_numbers<[1], [0], [0], [1], [0, 0, 1, 1], [], []>} : vector<8x32xbf16>, vector<32x128xbf16>, vector<8x128xf32> -> vector<8x128xf32>
    %185 = arith.addf %182, %184 : vector<8x128xf32>
    %186 = arith.negf %185 : vector<8x128xf32>
    %187 = math.exp %186 : vector<8x128xf32>
    %cst_32 = arith.constant 1.000000e+00 : f32
    %188 = vector.broadcast %cst_32 : f32 to vector<8x128xf32>
    %189 = arith.addf %188, %187 : vector<8x128xf32>
    %190 = arith.divf %188, %189 : vector<8x128xf32>
    %191 = math.tanh %185 : vector<8x128xf32>
    %192 = vector.extract_strided_slice %190 {offsets = [0, 0], sizes = [8, 32], strides = [1, 1]} : vector<8x128xf32> to vector<8x32xf32>
    %193 = vector.extract_strided_slice %190 {offsets = [0, 32], sizes = [8, 32], strides = [1, 1]} : vector<8x128xf32> to vector<8x32xf32>
    %194 = vector.extract_strided_slice %191 {offsets = [0, 64], sizes = [8, 32], strides = [1, 1]} : vector<8x128xf32> to vector<8x32xf32>
    %195 = vector.extract_strided_slice %190 {offsets = [0, 96], sizes = [8, 32], strides = [1, 1]} : vector<8x128xf32> to vector<8x32xf32>
    %196 = arith.mulf %193, %179 : vector<8x32xf32>
    %197 = arith.mulf %192, %194 : vector<8x32xf32>
    %198 = arith.addf %196, %197 : vector<8x32xf32>
    %199 = math.tanh %198 : vector<8x32xf32>
    %200 = arith.mulf %195, %199 : vector<8x32xf32>
    %201 = arith.truncf %200 : vector<8x32xf32> to vector<8x32xbf16>
    %c0_33 = arith.constant 0 : index
    %c0_34 = arith.constant 0 : index
    %202 = vector.load %arg5[%c0_33, %c0_34] : memref<32x128xbf16, #tpu.memory_space<vmem>>, vector<32x128xbf16>
    %cst_35 = arith.constant dense<0.000000e+00> : vector<8x128xf32>
    %203 = tpu.matmul %201, %202, %cst_35 {dimension_numbers = #tpu.dot_dimension_numbers<[1], [0], [0], [1], [0, 0, 1, 1], [], []>} : vector<8x32xbf16>, vector<32x128xbf16>, vector<8x128xf32> -> vector<8x128xf32>
    %c0_36 = arith.constant 0 : index
    %c0_37 = arith.constant 0 : index
    %204 = vector.load %arg7[%c0_36, %c0_37] : memref<1x128xf32, #tpu.memory_space<vmem>>, vector<1x128xf32>
    %205 = vector.broadcast %204 : vector<1x128xf32> to vector<8x128xf32>
    %206 = arith.addf %203, %205 : vector<8x128xf32>
    %cst_38 = arith.constant 0.000000e+00 : f32
    %207 = vector.broadcast %cst_38 : f32 to vector<8x128xf32>
    %208 = arith.truncf %200 : vector<8x32xf32> to vector<8x32xbf16>
    %cst_39 = arith.constant dense<0.000000e+00> : vector<8x128xf32>
    %209 = tpu.matmul %208, %1, %cst_39 {dimension_numbers = #tpu.dot_dimension_numbers<[1], [0], [0], [1], [0, 0, 1, 1], [], []>} : vector<8x32xbf16>, vector<32x128xbf16>, vector<8x128xf32> -> vector<8x128xf32>
    %210 = arith.addf %206, %209 : vector<8x128xf32>
    %211 = arith.negf %210 : vector<8x128xf32>
    %212 = math.exp %211 : vector<8x128xf32>
    %cst_40 = arith.constant 1.000000e+00 : f32
    %213 = vector.broadcast %cst_40 : f32 to vector<8x128xf32>
    %214 = arith.addf %213, %212 : vector<8x128xf32>
    %215 = arith.divf %213, %214 : vector<8x128xf32>
    %216 = math.tanh %210 : vector<8x128xf32>
    %217 = vector.extract_strided_slice %215 {offsets = [0, 0], sizes = [8, 32], strides = [1, 1]} : vector<8x128xf32> to vector<8x32xf32>
    %218 = vector.extract_strided_slice %215 {offsets = [0, 32], sizes = [8, 32], strides = [1, 1]} : vector<8x128xf32> to vector<8x32xf32>
    %219 = vector.extract_strided_slice %216 {offsets = [0, 64], sizes = [8, 32], strides = [1, 1]} : vector<8x128xf32> to vector<8x32xf32>
    %220 = vector.extract_strided_slice %215 {offsets = [0, 96], sizes = [8, 32], strides = [1, 1]} : vector<8x128xf32> to vector<8x32xf32>
    %221 = arith.mulf %218, %198 : vector<8x32xf32>
    %222 = arith.mulf %217, %219 : vector<8x32xf32>
    %223 = arith.addf %221, %222 : vector<8x32xf32>
    %224 = math.tanh %223 : vector<8x32xf32>
    %225 = arith.mulf %220, %224 : vector<8x32xf32>
    %226 = arith.truncf %225 : vector<8x32xf32> to vector<8x32xbf16>
    %227 = vector.extract_strided_slice %2 {offsets = [0, 0], sizes = [32, 128], strides = [1, 1]} : vector<256x128xbf16> to vector<32x128xbf16>
    %cst_41 = arith.constant dense<0.000000e+00> : vector<8x128xf32>
    %228 = tpu.matmul %226, %227, %cst_41 {dimension_numbers = #tpu.dot_dimension_numbers<[1], [0], [0], [1], [0, 0, 1, 1], [], []>} : vector<8x32xbf16>, vector<32x128xbf16>, vector<8x128xf32> -> vector<8x128xf32>
    %229 = arith.addf %207, %228 : vector<8x128xf32>
    %230 = arith.truncf %225 : vector<8x32xf32> to vector<8x32xbf16>
    %cst_42 = arith.constant dense<0.000000e+00> : vector<8x128xf32>
    %231 = tpu.matmul %230, %1, %cst_42 {dimension_numbers = #tpu.dot_dimension_numbers<[1], [0], [0], [1], [0, 0, 1, 1], [], []>} : vector<8x32xbf16>, vector<32x128xbf16>, vector<8x128xf32> -> vector<8x128xf32>
    %232 = arith.addf %206, %231 : vector<8x128xf32>
    %233 = arith.negf %232 : vector<8x128xf32>
    %234 = math.exp %233 : vector<8x128xf32>
    %cst_43 = arith.constant 1.000000e+00 : f32
    %235 = vector.broadcast %cst_43 : f32 to vector<8x128xf32>
    %236 = arith.addf %235, %234 : vector<8x128xf32>
    %237 = arith.divf %235, %236 : vector<8x128xf32>
    %238 = math.tanh %232 : vector<8x128xf32>
    %239 = vector.extract_strided_slice %237 {offsets = [0, 0], sizes = [8, 32], strides = [1, 1]} : vector<8x128xf32> to vector<8x32xf32>
    %240 = vector.extract_strided_slice %237 {offsets = [0, 32], sizes = [8, 32], strides = [1, 1]} : vector<8x128xf32> to vector<8x32xf32>
    %241 = vector.extract_strided_slice %238 {offsets = [0, 64], sizes = [8, 32], strides = [1, 1]} : vector<8x128xf32> to vector<8x32xf32>
    %242 = vector.extract_strided_slice %237 {offsets = [0, 96], sizes = [8, 32], strides = [1, 1]} : vector<8x128xf32> to vector<8x32xf32>
    %243 = arith.mulf %240, %223 : vector<8x32xf32>
    %244 = arith.mulf %239, %241 : vector<8x32xf32>
    %245 = arith.addf %243, %244 : vector<8x32xf32>
    %246 = math.tanh %245 : vector<8x32xf32>
    %247 = arith.mulf %242, %246 : vector<8x32xf32>
    %248 = arith.truncf %247 : vector<8x32xf32> to vector<8x32xbf16>
    %249 = vector.extract_strided_slice %2 {offsets = [32, 0], sizes = [32, 128], strides = [1, 1]} : vector<256x128xbf16> to vector<32x128xbf16>
    %cst_44 = arith.constant dense<0.000000e+00> : vector<8x128xf32>
    %250 = tpu.matmul %248, %249, %cst_44 {dimension_numbers = #tpu.dot_dimension_numbers<[1], [0], [0], [1], [0, 0, 1, 1], [], []>} : vector<8x32xbf16>, vector<32x128xbf16>, vector<8x128xf32> -> vector<8x128xf32>
    %251 = arith.addf %229, %250 : vector<8x128xf32>
    %252 = arith.truncf %247 : vector<8x32xf32> to vector<8x32xbf16>
    %cst_45 = arith.constant dense<0.000000e+00> : vector<8x128xf32>
    %253 = tpu.matmul %252, %1, %cst_45 {dimension_numbers = #tpu.dot_dimension_numbers<[1], [0], [0], [1], [0, 0, 1, 1], [], []>} : vector<8x32xbf16>, vector<32x128xbf16>, vector<8x128xf32> -> vector<8x128xf32>
    %254 = arith.addf %206, %253 : vector<8x128xf32>
    %255 = arith.negf %254 : vector<8x128xf32>
    %256 = math.exp %255 : vector<8x128xf32>
    %cst_46 = arith.constant 1.000000e+00 : f32
    %257 = vector.broadcast %cst_46 : f32 to vector<8x128xf32>
    %258 = arith.addf %257, %256 : vector<8x128xf32>
    %259 = arith.divf %257, %258 : vector<8x128xf32>
    %260 = math.tanh %254 : vector<8x128xf32>
    %261 = vector.extract_strided_slice %259 {offsets = [0, 0], sizes = [8, 32], strides = [1, 1]} : vector<8x128xf32> to vector<8x32xf32>
    %262 = vector.extract_strided_slice %259 {offsets = [0, 32], sizes = [8, 32], strides = [1, 1]} : vector<8x128xf32> to vector<8x32xf32>
    %263 = vector.extract_strided_slice %260 {offsets = [0, 64], sizes = [8, 32], strides = [1, 1]} : vector<8x128xf32> to vector<8x32xf32>
    %264 = vector.extract_strided_slice %259 {offsets = [0, 96], sizes = [8, 32], strides = [1, 1]} : vector<8x128xf32> to vector<8x32xf32>
    %265 = arith.mulf %262, %245 : vector<8x32xf32>
    %266 = arith.mulf %261, %263 : vector<8x32xf32>
    %267 = arith.addf %265, %266 : vector<8x32xf32>
    %268 = math.tanh %267 : vector<8x32xf32>
    %269 = arith.mulf %264, %268 : vector<8x32xf32>
    %270 = arith.truncf %269 : vector<8x32xf32> to vector<8x32xbf16>
    %271 = vector.extract_strided_slice %2 {offsets = [64, 0], sizes = [32, 128], strides = [1, 1]} : vector<256x128xbf16> to vector<32x128xbf16>
    %cst_47 = arith.constant dense<0.000000e+00> : vector<8x128xf32>
    %272 = tpu.matmul %270, %271, %cst_47 {dimension_numbers = #tpu.dot_dimension_numbers<[1], [0], [0], [1], [0, 0, 1, 1], [], []>} : vector<8x32xbf16>, vector<32x128xbf16>, vector<8x128xf32> -> vector<8x128xf32>
    %273 = arith.addf %251, %272 : vector<8x128xf32>
    %274 = arith.truncf %269 : vector<8x32xf32> to vector<8x32xbf16>
    %cst_48 = arith.constant dense<0.000000e+00> : vector<8x128xf32>
    %275 = tpu.matmul %274, %1, %cst_48 {dimension_numbers = #tpu.dot_dimension_numbers<[1], [0], [0], [1], [0, 0, 1, 1], [], []>} : vector<8x32xbf16>, vector<32x128xbf16>, vector<8x128xf32> -> vector<8x128xf32>
    %276 = arith.addf %206, %275 : vector<8x128xf32>
    %277 = arith.negf %276 : vector<8x128xf32>
    %278 = math.exp %277 : vector<8x128xf32>
    %cst_49 = arith.constant 1.000000e+00 : f32
    %279 = vector.broadcast %cst_49 : f32 to vector<8x128xf32>
    %280 = arith.addf %279, %278 : vector<8x128xf32>
    %281 = arith.divf %279, %280 : vector<8x128xf32>
    %282 = math.tanh %276 : vector<8x128xf32>
    %283 = vector.extract_strided_slice %281 {offsets = [0, 0], sizes = [8, 32], strides = [1, 1]} : vector<8x128xf32> to vector<8x32xf32>
    %284 = vector.extract_strided_slice %281 {offsets = [0, 32], sizes = [8, 32], strides = [1, 1]} : vector<8x128xf32> to vector<8x32xf32>
    %285 = vector.extract_strided_slice %282 {offsets = [0, 64], sizes = [8, 32], strides = [1, 1]} : vector<8x128xf32> to vector<8x32xf32>
    %286 = vector.extract_strided_slice %281 {offsets = [0, 96], sizes = [8, 32], strides = [1, 1]} : vector<8x128xf32> to vector<8x32xf32>
    %287 = arith.mulf %284, %267 : vector<8x32xf32>
    %288 = arith.mulf %283, %285 : vector<8x32xf32>
    %289 = arith.addf %287, %288 : vector<8x32xf32>
    %290 = math.tanh %289 : vector<8x32xf32>
    %291 = arith.mulf %286, %290 : vector<8x32xf32>
    %292 = arith.truncf %291 : vector<8x32xf32> to vector<8x32xbf16>
    %293 = vector.extract_strided_slice %2 {offsets = [96, 0], sizes = [32, 128], strides = [1, 1]} : vector<256x128xbf16> to vector<32x128xbf16>
    %cst_50 = arith.constant dense<0.000000e+00> : vector<8x128xf32>
    %294 = tpu.matmul %292, %293, %cst_50 {dimension_numbers = #tpu.dot_dimension_numbers<[1], [0], [0], [1], [0, 0, 1, 1], [], []>} : vector<8x32xbf16>, vector<32x128xbf16>, vector<8x128xf32> -> vector<8x128xf32>
    %295 = arith.addf %273, %294 : vector<8x128xf32>
    %296 = arith.truncf %291 : vector<8x32xf32> to vector<8x32xbf16>
    %cst_51 = arith.constant dense<0.000000e+00> : vector<8x128xf32>
    %297 = tpu.matmul %296, %1, %cst_51 {dimension_numbers = #tpu.dot_dimension_numbers<[1], [0], [0], [1], [0, 0, 1, 1], [], []>} : vector<8x32xbf16>, vector<32x128xbf16>, vector<8x128xf32> -> vector<8x128xf32>
    %298 = arith.addf %206, %297 : vector<8x128xf32>
    %299 = arith.negf %298 : vector<8x128xf32>
    %300 = math.exp %299 : vector<8x128xf32>
    %cst_52 = arith.constant 1.000000e+00 : f32
    %301 = vector.broadcast %cst_52 : f32 to vector<8x128xf32>
    %302 = arith.addf %301, %300 : vector<8x128xf32>
    %303 = arith.divf %301, %302 : vector<8x128xf32>
    %304 = math.tanh %298 : vector<8x128xf32>
    %305 = vector.extract_strided_slice %303 {offsets = [0, 0], sizes = [8, 32], strides = [1, 1]} : vector<8x128xf32> to vector<8x32xf32>
    %306 = vector.extract_strided_slice %303 {offsets = [0, 32], sizes = [8, 32], strides = [1, 1]} : vector<8x128xf32> to vector<8x32xf32>
    %307 = vector.extract_strided_slice %304 {offsets = [0, 64], sizes = [8, 32], strides = [1, 1]} : vector<8x128xf32> to vector<8x32xf32>
    %308 = vector.extract_strided_slice %303 {offsets = [0, 96], sizes = [8, 32], strides = [1, 1]} : vector<8x128xf32> to vector<8x32xf32>
    %309 = arith.mulf %306, %289 : vector<8x32xf32>
    %310 = arith.mulf %305, %307 : vector<8x32xf32>
    %311 = arith.addf %309, %310 : vector<8x32xf32>
    %312 = math.tanh %311 : vector<8x32xf32>
    %313 = arith.mulf %308, %312 : vector<8x32xf32>
    %314 = arith.truncf %313 : vector<8x32xf32> to vector<8x32xbf16>
    %315 = vector.extract_strided_slice %2 {offsets = [128, 0], sizes = [32, 128], strides = [1, 1]} : vector<256x128xbf16> to vector<32x128xbf16>
    %cst_53 = arith.constant dense<0.000000e+00> : vector<8x128xf32>
    %316 = tpu.matmul %314, %315, %cst_53 {dimension_numbers = #tpu.dot_dimension_numbers<[1], [0], [0], [1], [0, 0, 1, 1], [], []>} : vector<8x32xbf16>, vector<32x128xbf16>, vector<8x128xf32> -> vector<8x128xf32>
    %317 = arith.addf %295, %316 : vector<8x128xf32>
    %318 = arith.truncf %313 : vector<8x32xf32> to vector<8x32xbf16>
    %cst_54 = arith.constant dense<0.000000e+00> : vector<8x128xf32>
    %319 = tpu.matmul %318, %1, %cst_54 {dimension_numbers = #tpu.dot_dimension_numbers<[1], [0], [0], [1], [0, 0, 1, 1], [], []>} : vector<8x32xbf16>, vector<32x128xbf16>, vector<8x128xf32> -> vector<8x128xf32>
    %320 = arith.addf %206, %319 : vector<8x128xf32>
    %321 = arith.negf %320 : vector<8x128xf32>
    %322 = math.exp %321 : vector<8x128xf32>
    %cst_55 = arith.constant 1.000000e+00 : f32
    %323 = vector.broadcast %cst_55 : f32 to vector<8x128xf32>
    %324 = arith.addf %323, %322 : vector<8x128xf32>
    %325 = arith.divf %323, %324 : vector<8x128xf32>
    %326 = math.tanh %320 : vector<8x128xf32>
    %327 = vector.extract_strided_slice %325 {offsets = [0, 0], sizes = [8, 32], strides = [1, 1]} : vector<8x128xf32> to vector<8x32xf32>
    %328 = vector.extract_strided_slice %325 {offsets = [0, 32], sizes = [8, 32], strides = [1, 1]} : vector<8x128xf32> to vector<8x32xf32>
    %329 = vector.extract_strided_slice %326 {offsets = [0, 64], sizes = [8, 32], strides = [1, 1]} : vector<8x128xf32> to vector<8x32xf32>
    %330 = vector.extract_strided_slice %325 {offsets = [0, 96], sizes = [8, 32], strides = [1, 1]} : vector<8x128xf32> to vector<8x32xf32>
    %331 = arith.mulf %328, %311 : vector<8x32xf32>
    %332 = arith.mulf %327, %329 : vector<8x32xf32>
    %333 = arith.addf %331, %332 : vector<8x32xf32>
    %334 = math.tanh %333 : vector<8x32xf32>
    %335 = arith.mulf %330, %334 : vector<8x32xf32>
    %336 = arith.truncf %335 : vector<8x32xf32> to vector<8x32xbf16>
    %337 = vector.extract_strided_slice %2 {offsets = [160, 0], sizes = [32, 128], strides = [1, 1]} : vector<256x128xbf16> to vector<32x128xbf16>
    %cst_56 = arith.constant dense<0.000000e+00> : vector<8x128xf32>
    %338 = tpu.matmul %336, %337, %cst_56 {dimension_numbers = #tpu.dot_dimension_numbers<[1], [0], [0], [1], [0, 0, 1, 1], [], []>} : vector<8x32xbf16>, vector<32x128xbf16>, vector<8x128xf32> -> vector<8x128xf32>
    %339 = arith.addf %317, %338 : vector<8x128xf32>
    %340 = arith.truncf %335 : vector<8x32xf32> to vector<8x32xbf16>
    %cst_57 = arith.constant dense<0.000000e+00> : vector<8x128xf32>
    %341 = tpu.matmul %340, %1, %cst_57 {dimension_numbers = #tpu.dot_dimension_numbers<[1], [0], [0], [1], [0, 0, 1, 1], [], []>} : vector<8x32xbf16>, vector<32x128xbf16>, vector<8x128xf32> -> vector<8x128xf32>
    %342 = arith.addf %206, %341 : vector<8x128xf32>
    %343 = arith.negf %342 : vector<8x128xf32>
    %344 = math.exp %343 : vector<8x128xf32>
    %cst_58 = arith.constant 1.000000e+00 : f32
    %345 = vector.broadcast %cst_58 : f32 to vector<8x128xf32>
    %346 = arith.addf %345, %344 : vector<8x128xf32>
    %347 = arith.divf %345, %346 : vector<8x128xf32>
    %348 = math.tanh %342 : vector<8x128xf32>
    %349 = vector.extract_strided_slice %347 {offsets = [0, 0], sizes = [8, 32], strides = [1, 1]} : vector<8x128xf32> to vector<8x32xf32>
    %350 = vector.extract_strided_slice %347 {offsets = [0, 32], sizes = [8, 32], strides = [1, 1]} : vector<8x128xf32> to vector<8x32xf32>
    %351 = vector.extract_strided_slice %348 {offsets = [0, 64], sizes = [8, 32], strides = [1, 1]} : vector<8x128xf32> to vector<8x32xf32>
    %352 = vector.extract_strided_slice %347 {offsets = [0, 96], sizes = [8, 32], strides = [1, 1]} : vector<8x128xf32> to vector<8x32xf32>
    %353 = arith.mulf %350, %333 : vector<8x32xf32>
    %354 = arith.mulf %349, %351 : vector<8x32xf32>
    %355 = arith.addf %353, %354 : vector<8x32xf32>
    %356 = math.tanh %355 : vector<8x32xf32>
    %357 = arith.mulf %352, %356 : vector<8x32xf32>
    %358 = arith.truncf %357 : vector<8x32xf32> to vector<8x32xbf16>
    %359 = vector.extract_strided_slice %2 {offsets = [192, 0], sizes = [32, 128], strides = [1, 1]} : vector<256x128xbf16> to vector<32x128xbf16>
    %cst_59 = arith.constant dense<0.000000e+00> : vector<8x128xf32>
    %360 = tpu.matmul %358, %359, %cst_59 {dimension_numbers = #tpu.dot_dimension_numbers<[1], [0], [0], [1], [0, 0, 1, 1], [], []>} : vector<8x32xbf16>, vector<32x128xbf16>, vector<8x128xf32> -> vector<8x128xf32>
    %361 = arith.addf %339, %360 : vector<8x128xf32>
    %362 = arith.truncf %357 : vector<8x32xf32> to vector<8x32xbf16>
    %cst_60 = arith.constant dense<0.000000e+00> : vector<8x128xf32>
    %363 = tpu.matmul %362, %1, %cst_60 {dimension_numbers = #tpu.dot_dimension_numbers<[1], [0], [0], [1], [0, 0, 1, 1], [], []>} : vector<8x32xbf16>, vector<32x128xbf16>, vector<8x128xf32> -> vector<8x128xf32>
    %364 = arith.addf %206, %363 : vector<8x128xf32>
    %365 = arith.negf %364 : vector<8x128xf32>
    %366 = math.exp %365 : vector<8x128xf32>
    %cst_61 = arith.constant 1.000000e+00 : f32
    %367 = vector.broadcast %cst_61 : f32 to vector<8x128xf32>
    %368 = arith.addf %367, %366 : vector<8x128xf32>
    %369 = arith.divf %367, %368 : vector<8x128xf32>
    %370 = math.tanh %364 : vector<8x128xf32>
    %371 = vector.extract_strided_slice %369 {offsets = [0, 0], sizes = [8, 32], strides = [1, 1]} : vector<8x128xf32> to vector<8x32xf32>
    %372 = vector.extract_strided_slice %369 {offsets = [0, 32], sizes = [8, 32], strides = [1, 1]} : vector<8x128xf32> to vector<8x32xf32>
    %373 = vector.extract_strided_slice %370 {offsets = [0, 64], sizes = [8, 32], strides = [1, 1]} : vector<8x128xf32> to vector<8x32xf32>
    %374 = vector.extract_strided_slice %369 {offsets = [0, 96], sizes = [8, 32], strides = [1, 1]} : vector<8x128xf32> to vector<8x32xf32>
    %375 = arith.mulf %372, %355 : vector<8x32xf32>
    %376 = arith.mulf %371, %373 : vector<8x32xf32>
    %377 = arith.addf %375, %376 : vector<8x32xf32>
    %378 = math.tanh %377 : vector<8x32xf32>
    %379 = arith.mulf %374, %378 : vector<8x32xf32>
    %380 = arith.truncf %379 : vector<8x32xf32> to vector<8x32xbf16>
    %381 = vector.extract_strided_slice %2 {offsets = [224, 0], sizes = [32, 128], strides = [1, 1]} : vector<256x128xbf16> to vector<32x128xbf16>
    %cst_62 = arith.constant dense<0.000000e+00> : vector<8x128xf32>
    %382 = tpu.matmul %380, %381, %cst_62 {dimension_numbers = #tpu.dot_dimension_numbers<[1], [0], [0], [1], [0, 0, 1, 1], [], []>} : vector<8x32xbf16>, vector<32x128xbf16>, vector<8x128xf32> -> vector<8x128xf32>
    %383 = arith.addf %361, %382 : vector<8x128xf32>
    %c0_63 = arith.constant 0 : index
    %c0_64 = arith.constant 0 : index
    %384 = vector.load %arg9[%c0_63, %c0_64] : memref<1x128xf32, #tpu.memory_space<vmem>>, vector<1x128xf32>
    %385 = vector.broadcast %384 : vector<1x128xf32> to vector<8x128xf32>
    %386 = arith.addf %383, %385 : vector<8x128xf32>
    %c0_65 = arith.constant 0 : index
    %c0_66 = arith.constant 0 : index
    %387 = vector.load %arg10[%c0_65, %c0_66] : memref<8x128xf32, #tpu.memory_space<vmem>>, vector<8x128xf32>
    tpu.vector_store %arg10[%c0_65, %c0_66], %386 {strides = array<i32>} : memref<8x128xf32, #tpu.memory_space<vmem>>, vector<8x128xf32>,
    return
  }
  func.func @transform_0(%arg0: i32) -> (i32, i32) {
    %c0_i32 = arith.constant 0 : i32
    %c0_i32_0 = arith.constant 0 : i32
    %c0_i32_1 = arith.constant 0 : i32
    return %c0_i32, %c0_i32_0 : i32, i32
  }
  func.func @transform_1(%arg0: i32) -> (i32, i32) {
    %c0_i32 = arith.constant 0 : i32
    %c0_i32_0 = arith.constant 0 : i32
    %c0_i32_1 = arith.constant 0 : i32
    return %c0_i32, %c0_i32_0 : i32, i32
  }
  func.func @transform_2(%arg0: i32) -> (i32, i32) {
    %c0_i32 = arith.constant 0 : i32
    %c0_i32_0 = arith.constant 0 : i32
    %c0_i32_1 = arith.constant 0 : i32
    return %c0_i32, %c0_i32_0 : i32, i32
  }
  func.func @transform_3(%arg0: i32) -> (i32, i32) {
    %c0_i32 = arith.constant 0 : i32
    %c0_i32_0 = arith.constant 0 : i32
    %c0_i32_1 = arith.constant 0 : i32
    return %c0_i32, %c0_i32_0 : i32, i32
  }
  func.func @transform_4(%arg0: i32) -> (i32, i32) {
    %c0_i32 = arith.constant 0 : i32
    %c0_i32_0 = arith.constant 0 : i32
    %c0_i32_1 = arith.constant 0 : i32
    return %c0_i32, %c0_i32_0 : i32, i32
  }
  func.func @transform_5(%arg0: i32) -> (i32, i32) {
    %c0_i32 = arith.constant 0 : i32
    %c0_i32_0 = arith.constant 0 : i32
    %c0_i32_1 = arith.constant 0 : i32
    return %c0_i32, %c0_i32_0 : i32, i32
  }
  func.func @transform_6(%arg0: i32) -> (i32, i32) {
    %c0_i32 = arith.constant 0 : i32
    %c0_i32_0 = arith.constant 0 : i32
    %c0_i32_1 = arith.constant 0 : i32
    return %c0_i32, %c0_i32_0 : i32, i32
  }
  func.func @transform_7(%arg0: i32) -> (i32, i32) {
    %c0_i32 = arith.constant 0 : i32
    %c0_i32_0 = arith.constant 0 : i32
    %c0_i32_1 = arith.constant 0 : i32
    return %c0_i32, %c0_i32_0 : i32, i32
  }
  func.func @transform_8(%arg0: i32) -> (i32, i32) {
    %c0_i32 = arith.constant 0 : i32
    %c0_i32_0 = arith.constant 0 : i32
    %c0_i32_1 = arith.constant 0 : i32
    return %c0_i32, %c0_i32_0 : i32, i32
  }
  func.func @transform_9(%arg0: i32) -> (i32, i32) {
    %c0_i32 = arith.constant 0 : i32
    %c0_i32_0 = arith.constant 0 : i32
    %c0_i32_1 = arith.constant 0 : i32
    return %c0_i32, %c0_i32_0 : i32, i32
  }
}

</mosaic_0001>

<bundles_post_ra>
// kernel: tpu_custom_call.1
= control target key start
LH: loop header
LB: loop body
LE: loop exit
PB: predicated region body
PF: predicated region fallthrough
CT: control target
= control target key end

     0   :  { %14 = vsyncpa [#allocation3], 0  ;;  %s2270_s0 = inlined_call_operand.vmem [shape: bf16[80,6], index: 0, kind: input, shape index: {}]   ;;  %s2271_s1 = inlined_call_operand.hbm [shape: bf16[6,128], index: 1, kind: input, shape index: {}]   ;;  %s2272_s2 = inlined_call_operand.vmem [shape: bf16[32,128], index: 2, kind: input, shape index: {}]   ;;  %s2273_s3 = inlined_call_operand.hbm [shape: f32[1,128], index: 3, kind: input, shape index: {}]   ;;  %s2274_s4 = inlined_call_operand.vmem [shape: bf16[32,128], index: 4, kind: input, shape index: {}]   ;;  %s2275_s5 = inlined_call_operand.vmem [shape: bf16[32,128], index: 5, kind: input, shape index: {}]   ;;  %s2276_s6 = inlined_call_operand.vmem [shape: f32[1,128], index: 6, kind: input, shape index: {}]   ;;  %s2277_s7 = inlined_call_operand.hbm [shape: bf16[256,128], index: 7, kind: input, shape index: {}]   ;;  %s2278_s8 = inlined_call_operand.vmem [shape: f32[1,128], index: 8, kind: input, shape index: {}]   ;;  %s2279_s9 = inlined_call_operand.hbm [shape: f32[8,128], index: 9, kind: output, shape index: {}]  }
   0x1   :  { %15 = vsyncpa [#allocation6], 0  ;;  %s37_s11 = sshll.u32 %s2273_s3, 4  ;;  %s38_s11 = int_to_ptr.hbm [resolvable:$true] %s37_s11 }
   0x2   :  { %16 = vsyncpa [#allocation4], 0  ;;  %s1987_s12 = smov [#allocation5]   ;;  %s24_s16 = sshll.u32 %s2271_s1, 4  ;;  %s25_s16 = int_to_ptr.hbm [resolvable:$true] %s24_s16 }
   0x3   :  { %s39_s13 = sshll.u32 %s1987_s12, 4  ;;  %s1988_s17 = smov [#allocation2]   ;;  %s40_s13 = int_to_ptr.vmem [resolvable:$true] %s39_s13 }
   0x4   :  { %42 = dma.hbm_to_vmem [thread:$0]  %s38_s11, 16, %s40_s13, [#allocation6]  }
   0x5   :  { %s26_s18 = sshll.u32 %s1988_s17, 4  ;;  %s53_s21 = sshll.u32 %s2277_s7, 4  ;;  %s27_s18 = int_to_ptr.vmem [resolvable:$true] %s26_s18  ;;  %s54_s21 = int_to_ptr.hbm [resolvable:$true] %s53_s21 }
   0x6   :  { %29 = dma.hbm_to_vmem [thread:$0]  %s25_s16, 64, %s27_s18, [#allocation3]  }
   0x7   :  { %s1989_s3 = smov [#allocation7]   ;;  %s1990_s23 = smov 64  }
   0x8   :  { %s55_s22 = sshll.u32 %s1989_s3, 4  ;;  %s1991_s24 = smov 4   ;;  %s56_s22 = int_to_ptr.vmem [resolvable:$true] %s55_s22 }
   0x9   :  { %61 = dma.hbm_to_vmem [thread:$0]  %s54_s21, 2048, %s56_s22, [#allocation6], %s1990_s23, %s1990_s23, %s1991_s24  }
   0xa   :  { %1981 = dma.done.wait [#allocation3], 64  }
   0xb   :  { %1982 = vsyncadd [#allocation3], 4294967232 }
   0xc   :  { %1983 = dma.done.wait [#allocation6], 2064  }
   0xd   :  { %1984 = vsyncadd [#allocation6], 4294965232  ;;  %vm173_vm0 = vcmask 1042432   ;;  %v127_v0 = vld [vmem:[#allocation2] sm:$0x7]  ;;  %v2059_v1 = vld [vmem:[%s2272_s2 + $0x8] sm:$0xff] }
   0xe   :  { %v175_v2 = vsel %vm173_vm0, %v127_v0, 0  ;;  %v1723_v3 = vld [vmem:[%s2270_s0] sm:$0xff]  ;;  %233 = vmatpush.bf16.msra.mxu1 %v2059_v1  ;;  %vm157_vm1 = vcmask 48128   ;;  %291 = vmatpush.bf16.msra.mxu2 %v2059_v1  ;;  %v1992_v5 = vmov 0   ;;  %vm223_vm6 = vcmask 261120   ;;  %v1724_v61 = vld [vmem:[%s2270_s0 + $0x8] sm:$0xff] }
   0xf   :  { %184 = vmatpush.bf16.msra.mxu0 %v175_v2  ;;  %v2068_v4 = vld [vmem:[%s2272_s2] sm:$0xff]  ;;  %349 = vmatpush.bf16.msra.mxu3 %v2059_v1  ;;  %s1993_s2 = smov 32   ;;  %s1994_s24 = smov [#allocation8]  }
  0x10   :  { %v2084_v6 = vld [vmem:[#allocation5] ss:$0 sm:$0xff]  ;;  %s1533_s1 = sshll.u32 %s1994_s24, 4  ;;  %s1535_s7 = sshll.u32 %s2279_s9, 4  ;;  %s1534_s1 = int_to_ptr.vmem [resolvable:$true] %s1533_s1  ;;  %s1536_s7 = int_to_ptr.hbm [resolvable:$true] %s1535_s7 }
  0x12   :  { %1566 = vmatmul.msk.bf16.vlgmr.msra.gmra.mxu0 %vm157_vm1, %v1723_v3  ;;  %234 = vmatpush.bf16.msra.mxu1 %v2068_v4 }
  0x13   :  { %292 = vmatpush.bf16.msra.mxu2 %v2068_v4  ;;  %350 = vmatpush.bf16.msra.mxu3 %v2068_v4 }
  0x15   :  { %235 = vmatmul.bf16.vlgmr.msra.gmra.mxu1 %v1992_v5 }
  0x16   :  { %407 = vmatpush.bf16.msrb.mxu1 %v2059_v1 }
  0x17   :  { %465 = vmatpush.bf16.msrb.mxu2 %v2059_v1  ;;  %523 = vmatpush.bf16.msrb.mxu3 %v2059_v1 }
  0x1a   :  { %408 = vmatpush.bf16.msrb.mxu1 %v2068_v4 }
  0x1b   :  { %466 = vmatpush.bf16.msrb.mxu2 %v2068_v4  ;;  %524 = vmatpush.bf16.msrb.mxu3 %v2068_v4 }
  0x1e   :  { %581 = vmatpush.bf16.msra.mxu1 %v2059_v1 }
  0x22   :  { %582 = vmatpush.bf16.msra.mxu1 %v2068_v4  ;;  %1567 = vmatmul.msk.bf16.gmra.mxu0 %vm157_vm1, %v1724_v61 }
  0x8f   :  { %v186_v7 = vpop.f32.mrf.mxu0 }
  0x90   :  { %v187_v8 = vadd.f32 %v2084_v6, %v186_v7 }
  0x92   :  { %v236_v9 = vpop.f32.mrf.mxu1 }
  0x93   :  { %v240_v10 = vadd.f32 %v236_v9, %v187_v8 }
  0x95   :  { %1741 = vtanh.f32 %v240_v10  ;;  %v1579_v13 = vmul.f32 -1.442695, %v240_v10 }
  0x97   :  { %1743 = vpow2.f32 %v1579_v13  ;;  %v188_v36 = vpop.f32.mrf.mxu0 }
  0x98   :  { %v189_v37 = vadd.f32 %v2084_v6, %v188_v36 }
  0x9a   :  { %v238_v11 = vpop.f32.mrf.mxu1 }
  0x9b   :  { %v1742_v12 = vpop.eup %1741 }
  0x9c   :  { %263 = vrot.lane.b32.xlu0 %v1742_v12, %s1990_s23 }
  0x9d   :  { %v1744_v14 = vpop.eup %1743 }
  0x9e   :  { %v244_v15 = vadd.f32 1.0, %v1744_v14 }
  0x9f   :  { %v191_v3 = vpop.f32.mrf.mxu0 }
  0xa0   :  { %1745 = vrcp.f32 %v244_v15  ;;  %v256_v21 = vand.u32 2147483648, %v244_v15  ;;  %vm250_vm3 = vweird.f32 %v244_v15  ;;  %v254_v22 = vand.u32 2147483647, %v244_v15 }
  0xa1   :  { %v192_v5 = vadd.f32 %v2084_v6, %v191_v3 }
  0xa2   :  { %v257_v24 = vor.u32 1.1754944e-38, %v256_v21  ;;  %vm255_vm5 = vcmp.eq.f32.partialorder %v254_v22, 8.507059e+37 }
  0xa6   :  { %v1746_v16 = vpop.eup %1745 }
  0xa7   :  { %v246_v17 = vmul.f32 %v1746_v16, %v244_v15  ;;  %vm251_vm2 = vweird.f32 %v1746_v16 }
  0xa8   :  { %vm252_vm4 = vmor %vm250_vm3, %vm251_vm2 }
  0xa9   :  { %v247_v18 = vsub.f32 1.0, %v246_v17 }
  0xab   :  { %v248_v19 = vmul.f32 %v1746_v16, %v247_v18 }
  0xad   :  { %v249_v20 = vadd.f32 %v1746_v16, %v248_v19 }
  0xaf   :  { %v253_v23 = vsel %vm252_vm4, %v1746_v16, %v249_v20 }
  0xb0   :  { %v258_v26 = vsel %vm255_vm5, %v257_v24, %v253_v23 }
  0xb1   :  { %v261_v28 = vmul.f32 0.0, %v258_v26 }
 0x10e   :  { %v264_v25 = vpop.permute.xlu0 %263 }
 0x10f   :  { %v266_v27 = vmul.f32 %v264_v25, %v258_v26 }
 0x111   :  { %268 = vrot.lane.b32.xlu0 %v266_v27, %s1993_s2 }
 0x183   :  { %v269_v29 = vpop.permute.xlu0 %268 }
 0x184   :  { %v271_v30 = vadd.f32 %v269_v29, %v261_v28 }
 0x186   :  { %1747 = vtanh.f32 %v271_v30 }
 0x18c   :  { %v1748_v31 = vpop.eup %1747 }
 0x18d   :  { %274 = vrot.lane.b32.xlu1 %v1748_v31, %s1990_s23 }
 0x1ff   :  { %v275_v32 = vpop.permute.xlu1 %274 }
 0x200   :  { %v277_v33 = vmul.f32 %v275_v32, %v258_v26 }
 0x202   :  { %v278_v34 = vpack.c.bf16 %v277_v33, %v277_v33 }
 0x204   :  { %280 = vrot.lane.b32.xlu1 %v278_v34, %s1993_s2  ;;  %v193_v34 = vpop.f32.mrf.mxu0 }
 0x276   :  { %v281_v35 = vpop.permute.xlu1 %280 }
 0x277   :  { %1580 = vmatmul.msk.bf16.vlgmr.msra.gmra.mxu2 %vm223_vm6, %v281_v35  ;;  %v194_v35 = vadd.f32 %v2084_v6, %v193_v34 }
 0x278   :  { %639 = vmatpush.bf16.msra.mxu2 %v2059_v1 }
 0x27c   :  { %640 = vmatpush.bf16.msra.mxu2 %v2068_v4 }
 0x2fa   :  { %v294_v38 = vpop.f32.mrf.mxu2 }
 0x2fb   :  { %v298_v39 = vadd.f32 %v294_v38, %v189_v37 }
 0x2fd   :  { %1749 = vtanh.f32 %v298_v39  ;;  %v1581_v42 = vmul.f32 -1.442695, %v298_v39 }
 0x2ff   :  { %1751 = vpow2.f32 %v1581_v42 }
 0x302   :  { %v296_v40 = vpop.f32.mrf.mxu2 }
 0x303   :  { %v1750_v41 = vpop.eup %1749 }
 0x304   :  { %321 = vrot.lane.b32.xlu2 %v1750_v41, %s1990_s23 }
 0x305   :  { %v1752_v43 = vpop.eup %1751 }
 0x306   :  { %v302_v44 = vadd.f32 1.0, %v1752_v43 }
 0x308   :  { %1753 = vrcp.f32 %v302_v44  ;;  %v314_v50 = vand.u32 2147483648, %v302_v44  ;;  %vm308_vm8 = vweird.f32 %v302_v44  ;;  %v312_v51 = vand.u32 2147483647, %v302_v44 }
 0x30a   :  { %v315_v53 = vor.u32 1.1754944e-38, %v314_v50  ;;  %vm313_vm10 = vcmp.eq.f32.partialorder %v312_v51, 8.507059e+37 }
 0x30e   :  { %v1754_v45 = vpop.eup %1753 }
 0x30f   :  { %v304_v46 = vmul.f32 %v1754_v45, %v302_v44  ;;  %vm309_vm7 = vweird.f32 %v1754_v45 }
 0x310   :  { %vm310_vm9 = vmor %vm308_vm8, %vm309_vm7 }
 0x311   :  { %v305_v47 = vsub.f32 1.0, %v304_v46 }
 0x313   :  { %v306_v48 = vmul.f32 %v1754_v45, %v305_v47 }
 0x315   :  { %v307_v49 = vadd.f32 %v1754_v45, %v306_v48 }
 0x317   :  { %v311_v52 = vsel %vm310_vm9, %v1754_v45, %v307_v49 }
 0x318   :  { %v316_v55 = vsel %vm313_vm10, %v315_v53, %v311_v52 }
 0x319   :  { %v319_v57 = vmul.f32 %v316_v55, %v271_v30 }
 0x35e   :  { %v322_v54 = vpop.permute.xlu2 %321 }
 0x35f   :  { %v324_v56 = vmul.f32 %v322_v54, %v316_v55 }
 0x361   :  { %326 = vrot.lane.b32.xlu2 %v324_v56, %s1993_s2 }
 0x3bb   :  { %v327_v58 = vpop.permute.xlu2 %326 }
 0x3bc   :  { %v329_v59 = vadd.f32 %v327_v58, %v319_v57  ;;  %v1725_v57 = vld [vmem:[%s2270_s0 + $0x10] sm:$0xff] }
 0x3bd   :  { %1568 = vmatmul.msk.bf16.gmra.mxu0 %vm157_vm1, %v1725_v57 }
 0x3be   :  { %1755 = vtanh.f32 %v329_v59 }
 0x3c4   :  { %v1756_v60 = vpop.eup %1755 }
 0x3c5   :  { %332 = vrot.lane.b32.xlu0 %v1756_v60, %s1990_s23 }
 0x437   :  { %v333_v62 = vpop.permute.xlu0 %332 }
 0x438   :  { %v335_v63 = vmul.f32 %v333_v62, %v316_v55 }
 0x43a   :  { %v336_v0 = vpack.c.bf16 %v335_v63, %v335_v63  ;;  %v196_v62 = vpop.f32.mrf.mxu0 }
 0x43b   :  { %v197_v63 = vadd.f32 %v2084_v6, %v196_v62 }
 0x43c   :  { %338 = vrot.lane.b32.xlu1 %v336_v0, %s1993_s2 }
 0x4ae   :  { %v339_v2 = vpop.permute.xlu1 %338 }
 0x4af   :  { %1582 = vmatmul.msk.bf16.vlgmr.msra.gmra.mxu3 %vm223_vm6, %v339_v2 }
 0x4b0   :  { %697 = vmatpush.bf16.msra.mxu3 %v2059_v1 }
 0x4b4   :  { %698 = vmatpush.bf16.msra.mxu3 %v2068_v4 }
 0x532   :  { %v352_v7 = vpop.f32.mrf.mxu3 }
 0x533   :  { %v356_v8 = vadd.f32 %v352_v7, %v192_v5 }
 0x535   :  { %1757 = vtanh.f32 %v356_v8  ;;  %v1583_v11 = vmul.f32 -1.442695, %v356_v8 }
 0x537   :  { %1759 = vpow2.f32 %v1583_v11 }
 0x53a   :  { %v354_v9 = vpop.f32.mrf.mxu3 }
 0x53b   :  { %v1758_v10 = vpop.eup %1757 }
 0x53c   :  { %379 = vrot.lane.b32.xlu2 %v1758_v10, %s1990_s23 }
 0x53d   :  { %v1760_v12 = vpop.eup %1759 }
 0x53e   :  { %v360_v13 = vadd.f32 1.0, %v1760_v12 }
 0x540   :  { %1761 = vrcp.f32 %v360_v13  ;;  %v372_v19 = vand.u32 2147483648, %v360_v13  ;;  %vm366_vm12 = vweird.f32 %v360_v13  ;;  %v370_v20 = vand.u32 2147483647, %v360_v13 }
 0x542   :  { %v373_v22 = vor.u32 1.1754944e-38, %v372_v19  ;;  %vm371_vm14 = vcmp.eq.f32.partialorder %v370_v20, 8.507059e+37 }
 0x546   :  { %v1762_v14 = vpop.eup %1761 }
 0x547   :  { %v362_v15 = vmul.f32 %v1762_v14, %v360_v13  ;;  %vm367_vm11 = vweird.f32 %v1762_v14 }
 0x548   :  { %vm368_vm13 = vmor %vm366_vm12, %vm367_vm11 }
 0x549   :  { %v363_v16 = vsub.f32 1.0, %v362_v15 }
 0x54b   :  { %v364_v17 = vmul.f32 %v1762_v14, %v363_v16 }
 0x54d   :  { %v365_v18 = vadd.f32 %v1762_v14, %v364_v17 }
 0x54f   :  { %v369_v21 = vsel %vm368_vm13, %v1762_v14, %v365_v18 }
 0x550   :  { %v374_v24 = vsel %vm371_vm14, %v373_v22, %v369_v21 }
 0x551   :  { %v377_v26 = vmul.f32 %v374_v24, %v329_v59 }
 0x596   :  { %v380_v23 = vpop.permute.xlu2 %379 }
 0x597   :  { %v382_v25 = vmul.f32 %v380_v23, %v374_v24 }
 0x599   :  { %384 = vrot.lane.b32.xlu0 %v382_v25, %s1993_s2 }
 0x60b   :  { %v385_v27 = vpop.permute.xlu0 %384 }
 0x60c   :  { %v387_v28 = vadd.f32 %v385_v27, %v377_v26 }
 0x60e   :  { %1763 = vtanh.f32 %v387_v28 }
 0x614   :  { %v1764_v29 = vpop.eup %1763 }
 0x615   :  { %390 = vrot.lane.b32.xlu1 %v1764_v29, %s1990_s23 }
 0x687   :  { %v391_v30 = vpop.permute.xlu1 %390 }
 0x688   :  { %v393_v31 = vmul.f32 %v391_v30, %v374_v24  ;;  %v198_v30 = vpop.f32.mrf.mxu0 }
 0x68a   :  { %v394_v32 = vpack.c.bf16 %v393_v31, %v393_v31  ;;  %v199_v31 = vadd.f32 %v2084_v6, %v198_v30 }
 0x68c   :  { %396 = vrot.lane.b32.xlu2 %v394_v32, %s1993_s2 }
 0x6e6   :  { %v397_v33 = vpop.permute.xlu2 %396 }
 0x6e7   :  { %1584 = vmatmul.msk.bf16.vlgmr.msrb.gmra.mxu1 %vm223_vm6, %v397_v33 }
 0x6e8   :  { %755 = vmatpush.bf16.msrb.mxu1 %v2059_v1 }
 0x6ec   :  { %756 = vmatpush.bf16.msrb.mxu1 %v2068_v4 }
 0x764   :  { %v410_v36 = vpop.f32.mrf.mxu1 }
 0x765   :  { %v414_v37 = vadd.f32 %v410_v36, %v194_v35 }
 0x767   :  { %1765 = vtanh.f32 %v414_v37  ;;  %v1585_v40 = vmul.f32 -1.442695, %v414_v37 }
 0x769   :  { %1767 = vpow2.f32 %v1585_v40 }
 0x76c   :  { %v412_v38 = vpop.f32.mrf.mxu1 }
 0x76d   :  { %v1766_v39 = vpop.eup %1765 }
 0x76e   :  { %437 = vrot.lane.b32.xlu0 %v1766_v39, %s1990_s23 }
 0x76f   :  { %v1768_v41 = vpop.eup %1767 }
 0x770   :  { %v418_v42 = vadd.f32 1.0, %v1768_v41 }
 0x772   :  { %1769 = vrcp.f32 %v418_v42  ;;  %v430_v46 = vand.u32 2147483648, %v418_v42  ;;  %vm424_vm0 = vweird.f32 %v418_v42  ;;  %v428_v47 = vand.u32 2147483647, %v418_v42 }
 0x774   :  { %v431_v49 = vor.u32 1.1754944e-38, %v430_v46  ;;  %vm429_vm3 = vcmp.eq.f32.partialorder %v428_v47, 8.507059e+37 }
 0x778   :  { %v1770_v43 = vpop.eup %1769 }
 0x779   :  { %v420_v44 = vmul.f32 %v1770_v43, %v418_v42  ;;  %vm425_vm15 = vweird.f32 %v1770_v43 }
 0x77a   :  { %vm426_vm2 = vmor %vm424_vm0, %vm425_vm15 }
 0x77b   :  { %v421_v1 = vsub.f32 1.0, %v420_v44 }
 0x77d   :  { %v422_v45 = vmul.f32 %v1770_v43, %v421_v1 }
 0x77f   :  { %v423_v4 = vadd.f32 %v1770_v43, %v422_v45 }
 0x781   :  { %v427_v48 = vsel %vm426_vm2, %v1770_v43, %v423_v4 }
 0x782   :  { %v432_v51 = vsel %vm429_vm3, %v431_v49, %v427_v48 }
 0x783   :  { %v435_v53 = vmul.f32 %v432_v51, %v387_v28 }
 0x7e0   :  { %v438_v50 = vpop.permute.xlu0 %437 }
 0x7e1   :  { %v440_v52 = vmul.f32 %v438_v50, %v432_v51 }
 0x7e3   :  { %442 = vrot.lane.b32.xlu1 %v440_v52, %s1993_s2 }
 0x855   :  { %v443_v54 = vpop.permute.xlu1 %442 }
 0x856   :  { %v445_v55 = vadd.f32 %v443_v54, %v435_v53  ;;  %v1726_v53 = vld [vmem:[%s2270_s0 + $0x18] sm:$0xff] }
 0x857   :  { %1569 = vmatmul.msk.bf16.gmra.mxu0 %vm157_vm1, %v1726_v53 }
 0x858   :  { %1771 = vtanh.f32 %v445_v55 }
 0x85e   :  { %v1772_v56 = vpop.eup %1771 }
 0x85f   :  { %448 = vrot.lane.b32.xlu2 %v1772_v56, %s1990_s23 }
 0x8b9   :  { %v449_v58 = vpop.permute.xlu2 %448 }
 0x8ba   :  { %v451_v59 = vmul.f32 %v449_v58, %v432_v51 }
 0x8bc   :  { %v452_v60 = vpack.c.bf16 %v451_v59, %v451_v59 }
 0x8be   :  { %454 = vrot.lane.b32.xlu0 %v452_v60, %s1993_s2 }
 0x8d4   :  { %v201_v58 = vpop.f32.mrf.mxu0 }
 0x8d5   :  { %v202_v59 = vadd.f32 %v2084_v6, %v201_v58 }
 0x930   :  { %v455_v61 = vpop.permute.xlu0 %454 }
 0x931   :  { %1586 = vmatmul.msk.bf16.vlgmr.msrb.gmra.mxu2 %vm223_vm6, %v455_v61 }
 0x9b4   :  { %v468_v0 = vpop.f32.mrf.mxu2 }
 0x9b5   :  { %v472_v2 = vadd.f32 %v468_v0, %v197_v63 }
 0x9b7   :  { %1773 = vtanh.f32 %v472_v2  ;;  %v1587_v7 = vmul.f32 -1.442695, %v472_v2 }
 0x9b9   :  { %1775 = vpow2.f32 %v1587_v7 }
 0x9bc   :  { %v470_v3 = vpop.f32.mrf.mxu2 }
 0x9bd   :  { %v1774_v5 = vpop.eup %1773 }
 0x9be   :  { %495 = vrot.lane.b32.xlu1 %v1774_v5, %s1990_s23 }
 0x9bf   :  { %v1776_v8 = vpop.eup %1775 }
 0x9c0   :  { %v476_v9 = vadd.f32 1.0, %v1776_v8 }
 0x9c2   :  { %1777 = vrcp.f32 %v476_v9  ;;  %v488_v15 = vand.u32 2147483648, %v476_v9  ;;  %vm482_vm5 = vweird.f32 %v476_v9  ;;  %v486_v16 = vand.u32 2147483647, %v476_v9 }
 0x9c4   :  { %v489_v18 = vor.u32 1.1754944e-38, %v488_v15  ;;  %vm487_vm8 = vcmp.eq.f32.partialorder %v486_v16, 8.507059e+37 }
 0x9c8   :  { %v1778_v10 = vpop.eup %1777 }
 0x9c9   :  { %v478_v11 = vmul.f32 %v1778_v10, %v476_v9  ;;  %vm483_vm4 = vweird.f32 %v1778_v10 }
 0x9ca   :  { %vm484_vm7 = vmor %vm482_vm5, %vm483_vm4 }
 0x9cb   :  { %v479_v12 = vsub.f32 1.0, %v478_v11 }
 0x9cd   :  { %v480_v13 = vmul.f32 %v1778_v10, %v479_v12 }
 0x9cf   :  { %v481_v14 = vadd.f32 %v1778_v10, %v480_v13 }
 0x9d1   :  { %v485_v17 = vsel %vm484_vm7, %v1778_v10, %v481_v14 }
 0x9d2   :  { %v490_v20 = vsel %vm487_vm8, %v489_v18, %v485_v17 }
 0x9d3   :  { %v493_v22 = vmul.f32 %v490_v20, %v445_v55 }
 0xa30   :  { %v496_v19 = vpop.permute.xlu1 %495 }
 0xa31   :  { %v498_v21 = vmul.f32 %v496_v19, %v490_v20 }
 0xa33   :  { %500 = vrot.lane.b32.xlu2 %v498_v21, %s1993_s2 }
 0xa8d   :  { %v501_v23 = vpop.permute.xlu2 %500 }
 0xa8e   :  { %v503_v24 = vadd.f32 %v501_v23, %v493_v22 }
 0xa90   :  { %1779 = vtanh.f32 %v503_v24 }
 0xa96   :  { %v1780_v25 = vpop.eup %1779 }
 0xa97   :  { %506 = vrot.lane.b32.xlu0 %v1780_v25, %s1990_s23 }
 0xb09   :  { %v507_v26 = vpop.permute.xlu0 %506 }
 0xb0a   :  { %v509_v27 = vmul.f32 %v507_v26, %v490_v20  ;;  %v203_v26 = vpop.f32.mrf.mxu0 }
 0xb0c   :  { %v510_v28 = vpack.c.bf16 %v509_v27, %v509_v27  ;;  %v204_v27 = vadd.f32 %v2084_v6, %v203_v26 }
 0xb0e   :  { %512 = vrot.lane.b32.xlu1 %v510_v28, %s1993_s2 }
 0xb80   :  { %v513_v29 = vpop.permute.xlu1 %512 }
 0xb81   :  { %1588 = vmatmul.msk.bf16.vlgmr.msrb.gmra.mxu3 %vm223_vm6, %v513_v29 }
 0xc04   :  { %v526_v32 = vpop.f32.mrf.mxu3 }
 0xc05   :  { %v530_v33 = vadd.f32 %v526_v32, %v199_v31 }
 0xc07   :  { %1781 = vtanh.f32 %v530_v33  ;;  %v1589_v36 = vmul.f32 -1.442695, %v530_v33 }
 0xc09   :  { %1783 = vpow2.f32 %v1589_v36 }
 0xc0c   :  { %v528_v34 = vpop.f32.mrf.mxu3 }
 0xc0d   :  { %v1782_v35 = vpop.eup %1781 }
 0xc0e   :  { %553 = vrot.lane.b32.xlu2 %v1782_v35, %s1990_s23 }
 0xc0f   :  { %v1784_v37 = vpop.eup %1783 }
 0xc10   :  { %v534_v38 = vadd.f32 1.0, %v1784_v37 }
 0xc12   :  { %1785 = vrcp.f32 %v534_v38  ;;  %v546_v44 = vand.u32 2147483648, %v534_v38  ;;  %vm540_vm10 = vweird.f32 %v534_v38  ;;  %v544_v1 = vand.u32 2147483647, %v534_v38 }
 0xc14   :  { %v547_v4 = vor.u32 1.1754944e-38, %v546_v44  ;;  %vm545_vm12 = vcmp.eq.f32.partialorder %v544_v1, 8.507059e+37 }
 0xc18   :  { %v1786_v39 = vpop.eup %1785 }
 0xc19   :  { %v536_v40 = vmul.f32 %v1786_v39, %v534_v38  ;;  %vm541_vm9 = vweird.f32 %v1786_v39 }
 0xc1a   :  { %vm542_vm11 = vmor %vm540_vm10, %vm541_vm9 }
 0xc1b   :  { %v537_v41 = vsub.f32 1.0, %v536_v40 }
 0xc1d   :  { %v538_v42 = vmul.f32 %v1786_v39, %v537_v41 }
 0xc1f   :  { %v539_v43 = vadd.f32 %v1786_v39, %v538_v42 }
 0xc21   :  { %v543_v45 = vsel %vm542_vm11, %v1786_v39, %v539_v43 }
 0xc22   :  { %v548_v47 = vsel %vm545_vm12, %v547_v4, %v543_v45 }
 0xc23   :  { %v551_v49 = vmul.f32 %v548_v47, %v503_v24 }
 0xc68   :  { %v554_v46 = vpop.permute.xlu2 %553 }
 0xc69   :  { %v556_v48 = vmul.f32 %v554_v46, %v548_v47 }
 0xc6b   :  { %558 = vrot.lane.b32.xlu0 %v556_v48, %s1993_s2 }
 0xcdd   :  { %v559_v50 = vpop.permute.xlu0 %558 }
 0xcde   :  { %v561_v51 = vadd.f32 %v559_v50, %v551_v49  ;;  %v1727_v49 = vld [vmem:[%s2270_s0 + $0x20] sm:$0xff] }
 0xcdf   :  { %1570 = vmatmul.msk.bf16.gmra.mxu0 %vm157_vm1, %v1727_v49 }
 0xce0   :  { %1787 = vtanh.f32 %v561_v51 }
 0xce6   :  { %v1788_v52 = vpop.eup %1787 }
 0xce7   :  { %564 = vrot.lane.b32.xlu1 %v1788_v52, %s1990_s23 }
 0xd59   :  { %v565_v54 = vpop.permute.xlu1 %564 }
 0xd5a   :  { %v567_v55 = vmul.f32 %v565_v54, %v548_v47 }
 0xd5c   :  { %v568_v56 = vpack.c.bf16 %v567_v55, %v567_v55  ;;  %v206_v54 = vpop.f32.mrf.mxu0 }
 0xd5d   :  { %v207_v55 = vadd.f32 %v2084_v6, %v206_v54 }
 0xd5e   :  { %570 = vrot.lane.b32.xlu2 %v568_v56, %s1993_s2 }
 0xdb8   :  { %v571_v57 = vpop.permute.xlu2 %570 }
 0xdb9   :  { %1590 = vmatmul.msk.bf16.vlgmr.msra.gmra.mxu1 %vm223_vm6, %v571_v57 }
 0xe36   :  { %v584_v60 = vpop.f32.mrf.mxu1 }
 0xe37   :  { %v588_v61 = vadd.f32 %v584_v60, %v202_v59 }
 0xe39   :  { %1789 = vtanh.f32 %v588_v61  ;;  %v1591_v0 = vmul.f32 -1.442695, %v588_v61 }
 0xe3b   :  { %1791 = vpow2.f32 %v1591_v0 }
 0xe3e   :  { %v586_v62 = vpop.f32.mrf.mxu1 }
 0xe3f   :  { %v1790_v63 = vpop.eup %1789 }
 0xe40   :  { %611 = vrot.lane.b32.xlu0 %v1790_v63, %s1990_s23 }
 0xe41   :  { %v1792_v2 = vpop.eup %1791 }
 0xe42   :  { %v592_v3 = vadd.f32 1.0, %v1792_v2 }
 0xe44   :  { %1793 = vrcp.f32 %v592_v3  ;;  %v604_v11 = vand.u32 2147483648, %v592_v3  ;;  %vm598_vm14 = vweird.f32 %v592_v3  ;;  %v602_v12 = vand.u32 2147483647, %v592_v3 }
 0xe46   :  { %v605_v14 = vor.u32 1.1754944e-38, %v604_v11  ;;  %vm603_vm0 = vcmp.eq.f32.partialorder %v602_v12, 8.507059e+37 }
 0xe4a   :  { %v1794_v5 = vpop.eup %1793 }
 0xe4b   :  { %v594_v7 = vmul.f32 %v1794_v5, %v592_v3  ;;  %vm599_vm13 = vweird.f32 %v1794_v5 }
 0xe4c   :  { %vm600_vm15 = vmor %vm598_vm14, %vm599_vm13 }
 0xe4d   :  { %v595_v8 = vsub.f32 1.0, %v594_v7 }
 0xe4f   :  { %v596_v9 = vmul.f32 %v1794_v5, %v595_v8 }
 0xe51   :  { %v597_v10 = vadd.f32 %v1794_v5, %v596_v9 }
 0xe53   :  { %v601_v13 = vsel %vm600_vm15, %v1794_v5, %v597_v10 }
 0xe54   :  { %v606_v16 = vsel %vm603_vm0, %v605_v14, %v601_v13 }
 0xe55   :  { %v609_v18 = vmul.f32 %v606_v16, %v561_v51 }
 0xeb2   :  { %v612_v15 = vpop.permute.xlu0 %611 }
 0xeb3   :  { %v614_v17 = vmul.f32 %v612_v15, %v606_v16 }
 0xeb5   :  { %616 = vrot.lane.b32.xlu1 %v614_v17, %s1993_s2 }
 0xf27   :  { %v617_v19 = vpop.permute.xlu1 %616 }
 0xf28   :  { %v619_v20 = vadd.f32 %v617_v19, %v609_v18 }
 0xf2a   :  { %1795 = vtanh.f32 %v619_v20 }
 0xf30   :  { %v1796_v21 = vpop.eup %1795 }
 0xf31   :  { %622 = vrot.lane.b32.xlu2 %v1796_v21, %s1990_s23 }
 0xf8b   :  { %v623_v22 = vpop.permute.xlu2 %622 }
 0xf8c   :  { %v625_v23 = vmul.f32 %v623_v22, %v606_v16  ;;  %v208_v22 = vpop.f32.mrf.mxu0 }
 0xf8e   :  { %v626_v24 = vpack.c.bf16 %v625_v23, %v625_v23  ;;  %v209_v23 = vadd.f32 %v2084_v6, %v208_v22 }
 0xf90   :  { %628 = vrot.lane.b32.xlu0 %v626_v24, %s1993_s2 }
0x1002   :  { %v629_v25 = vpop.permute.xlu0 %628 }
0x1003   :  { %1592 = vmatmul.msk.bf16.vlgmr.msra.gmra.mxu2 %vm223_vm6, %v629_v25 }
0x1086   :  { %v642_v28 = vpop.f32.mrf.mxu2 }
0x1087   :  { %v646_v29 = vadd.f32 %v642_v28, %v204_v27 }
0x1089   :  { %1797 = vtanh.f32 %v646_v29  ;;  %v1593_v32 = vmul.f32 -1.442695, %v646_v29 }
0x108b   :  { %1799 = vpow2.f32 %v1593_v32 }
0x108e   :  { %v644_v30 = vpop.f32.mrf.mxu2 }
0x108f   :  { %v1798_v31 = vpop.eup %1797 }
0x1090   :  { %669 = vrot.lane.b32.xlu1 %v1798_v31, %s1990_s23 }
0x1091   :  { %v1800_v33 = vpop.eup %1799 }
0x1092   :  { %v650_v34 = vadd.f32 1.0, %v1800_v33 }
0x1094   :  { %1801 = vrcp.f32 %v650_v34  ;;  %v662_v40 = vand.u32 2147483648, %v650_v34  ;;  %vm656_vm3 = vweird.f32 %v650_v34  ;;  %v660_v41 = vand.u32 2147483647, %v650_v34 }
0x1096   :  { %v663_v43 = vor.u32 1.1754944e-38, %v662_v40  ;;  %vm661_vm5 = vcmp.eq.f32.partialorder %v660_v41, 8.507059e+37 }
0x109a   :  { %v1802_v35 = vpop.eup %1801 }
0x109b   :  { %v652_v36 = vmul.f32 %v1802_v35, %v650_v34  ;;  %vm657_vm2 = vweird.f32 %v1802_v35 }
0x109c   :  { %vm658_vm4 = vmor %vm656_vm3, %vm657_vm2 }
0x109d   :  { %v653_v37 = vsub.f32 1.0, %v652_v36 }
0x109f   :  { %v654_v38 = vmul.f32 %v1802_v35, %v653_v37 }
0x10a1   :  { %v655_v39 = vadd.f32 %v1802_v35, %v654_v38 }
0x10a3   :  { %v659_v42 = vsel %vm658_vm4, %v1802_v35, %v655_v39 }
0x10a4   :  { %v664_v1 = vsel %vm661_vm5, %v663_v43, %v659_v42 }
0x10a5   :  { %v667_v4 = vmul.f32 %v664_v1, %v619_v20 }
0x1102   :  { %v670_v44 = vpop.permute.xlu1 %669 }
0x1103   :  { %v672_v45 = vmul.f32 %v670_v44, %v664_v1 }
0x1105   :  { %674 = vrot.lane.b32.xlu2 %v672_v45, %s1993_s2  ;;  %v1729_v45 = vld [vmem:[%s2274_s4 + $0x8] sm:$0xff] }
0x1106   :  { %833 = vmatpush.bf16.msrb.mxu2 %v1729_v45 }
0x115f   :  { %v675_v46 = vpop.permute.xlu2 %674 }
0x1160   :  { %v677_v47 = vadd.f32 %v675_v46, %v667_v4  ;;  %v2172_v4 = vld [vmem:[%s2275_s5 + $0x8] sm:$0xff]  ;;  %v1728_v46 = vld [vmem:[%s2274_s4] sm:$0xff] }
0x1161   :  { %858 = vmatpush.bf16.msrb.mxu3 %v2172_v4  ;;  %916 = vmatpush.bf16.msra.mxu1 %v2172_v4 }
0x1162   :  { %1803 = vtanh.f32 %v677_v47  ;;  %1024 = vmatpush.bf16.msrb.mxu0 %v2172_v4  ;;  %834 = vmatpush.bf16.msrb.mxu2 %v1728_v46 }
0x1168   :  { %v1804_v48 = vpop.eup %1803 }
0x1169   :  { %680 = vrot.lane.b32.xlu0 %v1804_v48, %s1990_s23 }
0x11db   :  { %v681_v50 = vpop.permute.xlu0 %680 }
0x11dc   :  { %v683_v51 = vmul.f32 %v681_v50, %v664_v1 }
0x11de   :  { %v684_v52 = vpack.c.bf16 %v683_v51, %v683_v51 }
0x11e0   :  { %686 = vrot.lane.b32.xlu1 %v684_v52, %s1993_s2  ;;  %v1739_v52 = vld [vmem:[%s2276_s6] ss:$0 sm:$0xff] }
0x1252   :  { %v687_v53 = vpop.permute.xlu1 %686 }
0x1253   :  { %1594 = vmatmul.msk.bf16.vlgmr.msra.gmra.mxu3 %vm223_vm6, %v687_v53 }
0x12d6   :  { %v700_v56 = vpop.f32.mrf.mxu3 }
0x12d7   :  { %v704_v57 = vadd.f32 %v700_v56, %v207_v55 }
0x12d9   :  { %1805 = vtanh.f32 %v704_v57  ;;  %v1595_v60 = vmul.f32 -1.442695, %v704_v57 }
0x12db   :  { %1807 = vpow2.f32 %v1595_v60 }
0x12de   :  { %v702_v58 = vpop.f32.mrf.mxu3 }
0x12df   :  { %v1806_v59 = vpop.eup %1805 }
0x12e0   :  { %727 = vrot.lane.b32.xlu2 %v1806_v59, %s1990_s23 }
0x12e1   :  { %v1808_v61 = vpop.eup %1807 }
0x12e2   :  { %v708_v62 = vadd.f32 1.0, %v1808_v61 }
0x12e4   :  { %1809 = vrcp.f32 %v708_v62  ;;  %v720_v7 = vand.u32 2147483648, %v708_v62  ;;  %vm714_vm7 = vweird.f32 %v708_v62  ;;  %v718_v8 = vand.u32 2147483647, %v708_v62 }
0x12e6   :  { %v721_v10 = vor.u32 1.1754944e-38, %v720_v7  ;;  %vm719_vm9 = vcmp.eq.f32.partialorder %v718_v8, 8.507059e+37 }
0x12ea   :  { %v1810_v63 = vpop.eup %1809 }
0x12eb   :  { %v710_v0 = vmul.f32 %v1810_v63, %v708_v62  ;;  %vm715_vm1 = vweird.f32 %v1810_v63 }
0x12ec   :  { %vm716_vm8 = vmor %vm714_vm7, %vm715_vm1 }
0x12ed   :  { %v711_v2 = vsub.f32 1.0, %v710_v0 }
0x12ef   :  { %v712_v3 = vmul.f32 %v1810_v63, %v711_v2 }
0x12f1   :  { %v713_v5 = vadd.f32 %v1810_v63, %v712_v3 }
0x12f3   :  { %v717_v9 = vsel %vm716_vm8, %v1810_v63, %v713_v5 }
0x12f4   :  { %v722_v12 = vsel %vm719_vm9, %v721_v10, %v717_v9 }
0x12f5   :  { %v725_v14 = vmul.f32 %v722_v12, %v677_v47  ;;  %v2181_v47 = vld [vmem:[%s2275_s5] sm:$0xff] }
0x12f6   :  { %859 = vmatpush.bf16.msrb.mxu3 %v2181_v47  ;;  %917 = vmatpush.bf16.msra.mxu1 %v2181_v47 }
0x12f7   :  { %1025 = vmatpush.bf16.msrb.mxu0 %v2181_v47 }
0x12fb   :  { %1192 = vmatpush.bf16.msra.mxu0 %v2172_v4 }
0x12ff   :  { %1193 = vmatpush.bf16.msra.mxu0 %v2181_v47 }
0x133a   :  { %v728_v11 = vpop.permute.xlu2 %727 }
0x133b   :  { %v730_v13 = vmul.f32 %v728_v11, %v722_v12 }
0x133d   :  { %732 = vrot.lane.b32.xlu0 %v730_v13, %s1993_s2 }
0x13af   :  { %v733_v15 = vpop.permute.xlu0 %732 }
0x13b0   :  { %v735_v16 = vadd.f32 %v733_v15, %v725_v14 }
0x13b2   :  { %1811 = vtanh.f32 %v735_v16 }
0x13b8   :  { %v1812_v17 = vpop.eup %1811 }
0x13b9   :  { %738 = vrot.lane.b32.xlu1 %v1812_v17, %s1990_s23 }
0x142b   :  { %v739_v18 = vpop.permute.xlu1 %738 }
0x142c   :  { %v741_v19 = vmul.f32 %v739_v18, %v722_v12  ;;  %v1708_v18 = vld [vmem:[#allocation7 + $0x8] sm:$0xff] }
0x142d   :  { %1011 = vmatpush.bf16.msra.mxu3 %v1708_v18 }
0x142e   :  { %v742_v20 = vpack.c.bf16 %v741_v19, %v741_v19  ;;  %v1707_v19 = vld [vmem:[#allocation7] sm:$0xff] }
0x1430   :  { %744 = vrot.lane.b32.xlu2 %v742_v20, %s1993_s2 }
0x1431   :  { %1012 = vmatpush.bf16.msra.mxu3 %v1707_v19  ;;  %v1712_v19 = vld [vmem:[#allocation7 + $0x28] sm:$0xff] }
0x148a   :  { %v745_v21 = vpop.permute.xlu2 %744 }
0x148b   :  { %1596 = vmatmul.msk.bf16.vlgmr.msrb.gmra.mxu1 %vm223_vm6, %v745_v21 }
0x148c   :  { %1094 = vmatpush.bf16.msrb.mxu1 %v1712_v19 }
0x1508   :  { %v758_v24 = vpop.f32.mrf.mxu1 }
0x1509   :  { %v762_v25 = vadd.f32 %v758_v24, %v209_v23 }
0x150b   :  { %1813 = vtanh.f32 %v762_v25  ;;  %v1597_v28 = vmul.f32 -1.442695, %v762_v25 }
0x150d   :  { %1815 = vpow2.f32 %v1597_v28 }
0x1510   :  { %v760_v26 = vpop.f32.mrf.mxu1 }
0x1511   :  { %v1814_v27 = vpop.eup %1813 }
0x1512   :  { %785 = vrot.lane.b32.xlu0 %v1814_v27, %s1990_s23 }
0x1513   :  { %v1816_v29 = vpop.eup %1815 }
0x1514   :  { %v766_v30 = vadd.f32 1.0, %v1816_v29 }
0x1516   :  { %1817 = vrcp.f32 %v766_v30  ;;  %v778_v36 = vand.u32 2147483648, %v766_v30  ;;  %vm772_vm11 = vweird.f32 %v766_v30  ;;  %v776_v6 = vand.u32 2147483647, %v766_v30 }
0x1518   :  { %v779_v38 = vor.u32 1.1754944e-38, %v778_v36  ;;  %vm777_vm13 = vcmp.eq.f32.partialorder %v776_v6, 8.507059e+37 }
0x151c   :  { %v1818_v31 = vpop.eup %1817 }
0x151d   :  { %v768_v32 = vmul.f32 %v1818_v31, %v766_v30  ;;  %vm773_vm10 = vweird.f32 %v1818_v31 }
0x151e   :  { %vm774_vm12 = vmor %vm772_vm11, %vm773_vm10 }
0x151f   :  { %v769_v33 = vsub.f32 1.0, %v768_v32 }
0x1521   :  { %v770_v34 = vmul.f32 %v1818_v31, %v769_v33 }
0x1523   :  { %v771_v35 = vadd.f32 %v1818_v31, %v770_v34 }
0x1525   :  { %v775_v37 = vsel %vm774_vm12, %v1818_v31, %v771_v35 }
0x1526   :  { %v780_v40 = vsel %vm777_vm13, %v779_v38, %v775_v37 }
0x1527   :  { %v783_v42 = vmul.f32 %v780_v40, %v735_v16 }
0x1584   :  { %v786_v39 = vpop.permute.xlu0 %785 }
0x1585   :  { %v788_v41 = vmul.f32 %v786_v39, %v780_v40 }
0x1587   :  { %790 = vrot.lane.b32.xlu1 %v788_v41, %s1993_s2 }
0x15f9   :  { %v791_v43 = vpop.permute.xlu1 %790 }
0x15fa   :  { %v793_v44 = vadd.f32 %v791_v43, %v783_v42 }
0x15fc   :  { %1819 = vtanh.f32 %v793_v44 }
0x1602   :  { %v1820_v1 = vpop.eup %1819 }
0x1603   :  { %796 = vrot.lane.b32.xlu2 %v1820_v1, %s1990_s23 }
0x165d   :  { %v797_v48 = vpop.permute.xlu2 %796 }
0x165e   :  { %v799_v49 = vmul.f32 %v797_v48, %v780_v40  ;;  %v1710_v48 = vld [vmem:[#allocation7 + $0x18] sm:$0xff] }
0x165f   :  { %986 = vmatpush.bf16.msra.mxu2 %v1710_v48 }
0x1660   :  { %v800_v50 = vpack.c.bf16 %v799_v49, %v799_v49  ;;  %v1709_v49 = vld [vmem:[#allocation7 + $0x10] sm:$0xff] }
0x1662   :  { %810 = vrot.lane.b32.xlu0 %v800_v50, %s1993_s2 }
0x1663   :  { %987 = vmatpush.bf16.msra.mxu2 %v1709_v49  ;;  %v1714_v49 = vld [vmem:[#allocation7 + $0x38] sm:$0xff] }
0x16d4   :  { %v811_v51 = vpop.permute.xlu0 %810 }
0x16d5   :  { %1606 = vmatmul.msk.bf16.vlgmr.msrb.gmra.mxu2 %vm223_vm6, %v811_v51  ;;  %1615 = vmatmul.msk.bf16.vlgmr.msrb.gmra.mxu3 %vm223_vm6, %v811_v51 }
0x16d6   :  { %1108 = vmatpush.bf16.msrb.mxu2 %v2172_v4  ;;  %1178 = vmatpush.bf16.msrb.mxu3 %v1714_v49 }
0x16da   :  { %1109 = vmatpush.bf16.msrb.mxu2 %v2181_v47 }
0x1758   :  { %v836_v53 = vpop.f32.mrf.mxu2  ;;  %v861_v54 = vpop.f32.mrf.mxu3 }
0x1759   :  { %v2196_v55 = vadd.f32 %v1739_v52, %v836_v53 }
0x175b   :  { %v865_v56 = vadd.f32 %v861_v54, %v2196_v55 }
0x175d   :  { %1821 = vtanh.f32 %v865_v56  ;;  %v1616_v60 = vmul.f32 -1.442695, %v865_v56 }
0x175f   :  { %1823 = vpow2.f32 %v1616_v60 }
0x1760   :  { %v838_v57 = vpop.f32.mrf.mxu2  ;;  %v863_v58 = vpop.f32.mrf.mxu3 }
0x1763   :  { %v1822_v59 = vpop.eup %1821 }
0x1764   :  { %888 = vrot.lane.b32.xlu1 %v1822_v59, %s1990_s23 }
0x1765   :  { %v1824_v61 = vpop.eup %1823 }
0x1766   :  { %v869_v62 = vadd.f32 1.0, %v1824_v61 }
0x1768   :  { %1825 = vrcp.f32 %v869_v62  ;;  %v881_v7 = vand.u32 2147483648, %v869_v62  ;;  %vm875_vm15 = vweird.f32 %v869_v62  ;;  %v879_v8 = vand.u32 2147483647, %v869_v62 }
0x176a   :  { %v882_v10 = vor.u32 1.1754944e-38, %v881_v7  ;;  %vm880_vm2 = vcmp.eq.f32.partialorder %v879_v8, 8.507059e+37 }
0x176e   :  { %v1826_v63 = vpop.eup %1825 }
0x176f   :  { %v871_v0 = vmul.f32 %v1826_v63, %v869_v62  ;;  %vm876_vm14 = vweird.f32 %v1826_v63 }
0x1770   :  { %vm877_vm0 = vmor %vm875_vm15, %vm876_vm14 }
0x1771   :  { %v872_v2 = vsub.f32 1.0, %v871_v0 }
0x1773   :  { %v873_v3 = vmul.f32 %v1826_v63, %v872_v2 }
0x1775   :  { %v874_v5 = vadd.f32 %v1826_v63, %v873_v3 }
0x1777   :  { %v878_v9 = vsel %vm877_vm0, %v1826_v63, %v874_v5 }
0x1778   :  { %v883_v12 = vsel %vm880_vm2, %v882_v10, %v878_v9 }
0x1779   :  { %v886_v14 = vmul.f32 %v883_v12, %v793_v44 }
0x17d6   :  { %v889_v11 = vpop.permute.xlu1 %888 }
0x17d7   :  { %v891_v13 = vmul.f32 %v889_v11, %v883_v12 }
0x17d9   :  { %893 = vrot.lane.b32.xlu2 %v891_v13, %s1993_s2 }
0x1833   :  { %v894_v15 = vpop.permute.xlu2 %893 }
0x1834   :  { %v896_v16 = vadd.f32 %v894_v15, %v886_v14 }
0x1836   :  { %1827 = vtanh.f32 %v896_v16 }
0x183c   :  { %v1828_v17 = vpop.eup %1827 }
0x183d   :  { %899 = vrot.lane.b32.xlu0 %v1828_v17, %s1990_s23 }
0x18af   :  { %v900_v20 = vpop.permute.xlu0 %899 }
0x18b0   :  { %v902_v21 = vmul.f32 %v900_v20, %v883_v12  ;;  %v1711_v20 = vld [vmem:[#allocation7 + $0x20] sm:$0xff] }
0x18b1   :  { %1095 = vmatpush.bf16.msrb.mxu1 %v1711_v20 }
0x18b2   :  { %v903_v22 = vpack.c.bf16 %v902_v21, %v902_v21 }
0x18b4   :  { %905 = vrot.lane.b32.xlu1 %v903_v22, %s1993_s2 }
0x1926   :  { %v906_v23 = vpop.permute.xlu1 %905 }
0x1927   :  { %1617 = vmatmul.msk.bf16.vlgmr.msra.gmra.mxu1 %vm223_vm6, %v906_v23  ;;  %1636 = vmatmul.msk.bf16.vlgmr.msra.gmra.mxu3 %vm223_vm6, %v906_v23 }
0x19a4   :  { %v919_v24 = vpop.f32.mrf.mxu1 }
0x19a5   :  { %v923_v25 = vadd.f32 %v919_v24, %v2196_v55 }
0x19a7   :  { %1829 = vtanh.f32 %v923_v25  ;;  %v1618_v30 = vmul.f32 -1.442695, %v923_v25 }
0x19a9   :  { %1831 = vpow2.f32 %v1618_v30 }
0x19aa   :  { %v2206_v26 = vpop.f32.mrf.mxu3 }
0x19ac   :  { %v921_v27 = vpop.f32.mrf.mxu1 }
0x19ad   :  { %v1830_v28 = vpop.eup %1829 }
0x19ae   :  { %946 = vrot.lane.b32.xlu2 %v1830_v28, %s1990_s23 }
0x19af   :  { %v1832_v31 = vpop.eup %1831 }
0x19b0   :  { %v927_v32 = vadd.f32 1.0, %v1832_v31 }
0x19b2   :  { %v1016_v29 = vpop.f32.mrf.mxu3  ;;  %1833 = vrcp.f32 %v927_v32  ;;  %v939_v37 = vand.u32 2147483648, %v927_v32  ;;  %vm933_vm4 = vweird.f32 %v927_v32  ;;  %v937_v38 = vand.u32 2147483647, %v927_v32 }
0x19b4   :  { %v940_v40 = vor.u32 1.1754944e-38, %v939_v37  ;;  %vm938_vm1 = vcmp.eq.f32.partialorder %v937_v38, 8.507059e+37 }
0x19b8   :  { %v1834_v33 = vpop.eup %1833 }
0x19b9   :  { %v929_v34 = vmul.f32 %v1834_v33, %v927_v32  ;;  %vm934_vm3 = vweird.f32 %v1834_v33 }
0x19ba   :  { %vm935_vm5 = vmor %vm933_vm4, %vm934_vm3 }
0x19bb   :  { %v930_v35 = vsub.f32 1.0, %v929_v34 }
0x19bd   :  { %v931_v36 = vmul.f32 %v1834_v33, %v930_v35 }
0x19bf   :  { %v932_v6 = vadd.f32 %v1834_v33, %v931_v36 }
0x19c1   :  { %v936_v39 = vsel %vm935_vm5, %v1834_v33, %v932_v6 }
0x19c2   :  { %v941_v42 = vsel %vm938_vm1, %v940_v40, %v936_v39 }
0x19c3   :  { %v944_v44 = vmul.f32 %v941_v42, %v896_v16 }
0x1a08   :  { %v947_v41 = vpop.permute.xlu2 %946 }
0x1a09   :  { %v949_v43 = vmul.f32 %v947_v41, %v941_v42 }
0x1a0b   :  { %951 = vrot.lane.b32.xlu0 %v949_v43, %s1993_s2 }
0x1a7d   :  { %v952_v1 = vpop.permute.xlu0 %951 }
0x1a7e   :  { %v954_v45 = vadd.f32 %v952_v1, %v944_v44 }
0x1a80   :  { %1835 = vtanh.f32 %v954_v45 }
0x1a86   :  { %v1836_v46 = vpop.eup %1835 }
0x1a87   :  { %957 = vrot.lane.b32.xlu1 %v1836_v46, %s1990_s23 }
0x1af9   :  { %v958_v50 = vpop.permute.xlu1 %957 }
0x1afa   :  { %v960_v51 = vmul.f32 %v958_v50, %v941_v42  ;;  %v1713_v50 = vld [vmem:[#allocation7 + $0x30] sm:$0xff] }
0x1afb   :  { %1179 = vmatpush.bf16.msrb.mxu3 %v1713_v50  ;;  %v1718_v50 = vld [vmem:[#allocation7 + $0x58] sm:$0xff] }
0x1afc   :  { %v961_v52 = vpack.c.bf16 %v960_v51, %v960_v51 }
0x1afe   :  { %963 = vrot.lane.b32.xlu2 %v961_v52, %s1993_s2 }
0x1aff   :  { %1346 = vmatpush.bf16.msra.mxu3 %v1718_v50  ;;  %v1722_v50 = vld [vmem:[#allocation7 + $0x78] sm:$0xff] }
0x1b58   :  { %v964_v53 = vpop.permute.xlu2 %963 }
0x1b59   :  { %1627 = vmatmul.msk.bf16.vlgmr.msra.gmra.mxu2 %vm223_vm6, %v964_v53  ;;  %1637 = vmatmul.msk.bf16.vlgmr.msrb.gmra.mxu0 %vm223_vm6, %v964_v53 }
0x1b5a   :  { %1276 = vmatpush.bf16.msra.mxu2 %v2172_v4  ;;  %1360 = vmatpush.bf16.msrb.mxu0 %v2172_v4 }
0x1b5e   :  { %1277 = vmatpush.bf16.msra.mxu2 %v2181_v47  ;;  %1361 = vmatpush.bf16.msrb.mxu0 %v2181_v47 }
0x1bd6   :  { %v1027_v54 = vpop.f32.mrf.mxu0 }
0x1bd7   :  { %v1031_v56 = vadd.f32 %v1027_v54, %v2196_v55 }
0x1bd9   :  { %1837 = vtanh.f32 %v1031_v56  ;;  %v1638_v61 = vmul.f32 -1.442695, %v1031_v56 }
0x1bdb   :  { %1839 = vpow2.f32 %v1638_v61 }
0x1bdc   :  { %v989_v57 = vpop.f32.mrf.mxu2 }
0x1bdd   :  { %v1015_v25 = vadd.f32 %v2206_v26, %v989_v57 }
0x1bde   :  { %v1029_v58 = vpop.f32.mrf.mxu0 }
0x1bdf   :  { %v1838_v59 = vpop.eup %1837 }
0x1be0   :  { %1054 = vrot.lane.b32.xlu0 %v1838_v59, %s1990_s23 }
0x1be1   :  { %v1840_v62 = vpop.eup %1839 }
0x1be2   :  { %v1035_v63 = vadd.f32 1.0, %v1840_v62 }
0x1be4   :  { %v991_v60 = vpop.f32.mrf.mxu2  ;;  %1841 = vrcp.f32 %v1035_v63  ;;  %v1047_v8 = vand.u32 2147483648, %v1035_v63  ;;  %vm1041_vm8 = vweird.f32 %v1035_v63  ;;  %v1045_v9 = vand.u32 2147483647, %v1035_v63 }
0x1be6   :  { %v1048_v11 = vor.u32 1.1754944e-38, %v1047_v8  ;;  %vm1046_vm10 = vcmp.eq.f32.partialorder %v1045_v9, 8.507059e+37 }
0x1bea   :  { %v1842_v0 = vpop.eup %1841 }
0x1beb   :  { %v1037_v2 = vmul.f32 %v1842_v0, %v1035_v63  ;;  %vm1042_vm7 = vweird.f32 %v1842_v0 }
0x1bec   :  { %vm1043_vm9 = vmor %vm1041_vm8, %vm1042_vm7 }
0x1bed   :  { %v1038_v3 = vsub.f32 1.0, %v1037_v2 }
0x1bef   :  { %v1039_v5 = vmul.f32 %v1842_v0, %v1038_v3 }
0x1bf1   :  { %v1040_v7 = vadd.f32 %v1842_v0, %v1039_v5 }
0x1bf3   :  { %v1044_v10 = vsel %vm1043_vm9, %v1842_v0, %v1040_v7 }
0x1bf4   :  { %v1049_v13 = vsel %vm1046_vm10, %v1048_v11, %v1044_v10 }
0x1bf5   :  { %v1052_v15 = vmul.f32 %v1049_v13, %v954_v45 }
0x1c52   :  { %v1055_v12 = vpop.permute.xlu0 %1054 }
0x1c53   :  { %v1057_v14 = vmul.f32 %v1055_v12, %v1049_v13 }
0x1c55   :  { %1059 = vrot.lane.b32.xlu1 %v1057_v14, %s1993_s2 }
0x1cc7   :  { %v1060_v16 = vpop.permute.xlu1 %1059 }
0x1cc8   :  { %v1062_v17 = vadd.f32 %v1060_v16, %v1052_v15 }
0x1cca   :  { %1843 = vtanh.f32 %v1062_v17 }
0x1cd0   :  { %v1844_v18 = vpop.eup %1843 }
0x1cd1   :  { %1065 = vrot.lane.b32.xlu2 %v1844_v18, %s1990_s23 }
0x1d2b   :  { %v1066_v21 = vpop.permute.xlu2 %1065 }
0x1d2c   :  { %v1068_v22 = vmul.f32 %v1066_v21, %v1049_v13  ;;  %v1716_v21 = vld [vmem:[#allocation7 + $0x48] sm:$0xff] }
0x1d2d   :  { %1262 = vmatpush.bf16.msra.mxu1 %v1716_v21 }
0x1d2e   :  { %v1069_v23 = vpack.c.bf16 %v1068_v22, %v1068_v22  ;;  %v1715_v22 = vld [vmem:[#allocation7 + $0x40] sm:$0xff] }
0x1d30   :  { %1071 = vrot.lane.b32.xlu0 %v1069_v23, %s1993_s2 }
0x1d31   :  { %1263 = vmatpush.bf16.msra.mxu1 %v1715_v22  ;;  %v1720_v22 = vld [vmem:[#allocation7 + $0x68] sm:$0xff] }
0x1da2   :  { %v1072_v24 = vpop.permute.xlu0 %1071 }
0x1da3   :  { %1647 = vmatmul.msk.bf16.vlgmr.msrb.gmra.mxu1 %vm223_vm6, %v1072_v24  ;;  %1648 = vmatmul.msk.bf16.vlgmr.msrb.gmra.mxu2 %vm223_vm6, %v1072_v24 }
0x1da4   :  { %1444 = vmatpush.bf16.msrb.mxu2 %v2172_v4  ;;  %1430 = vmatpush.bf16.msrb.mxu1 %v1720_v22 }
0x1da8   :  { %1445 = vmatpush.bf16.msrb.mxu2 %v2181_v47 }
0x1e20   :  { %v1097_v27 = vpop.f32.mrf.mxu1 }
0x1e21   :  { %v1101_v28 = vadd.f32 %v1097_v27, %v1015_v25 }
0x1e26   :  { %v1111_v29 = vpop.f32.mrf.mxu2 }
0x1e27   :  { %v1115_v30 = vadd.f32 %v1111_v29, %v2196_v55 }
0x1e28   :  { %v1099_v31 = vpop.f32.mrf.mxu1 }
0x1e29   :  { %1845 = vtanh.f32 %v1115_v30  ;;  %v1649_v34 = vmul.f32 -1.442695, %v1115_v30 }
0x1e2b   :  { %1847 = vpow2.f32 %v1649_v34 }
0x1e2e   :  { %v1113_v32 = vpop.f32.mrf.mxu2 }
0x1e2f   :  { %v1846_v33 = vpop.eup %1845 }
0x1e30   :  { %1138 = vrot.lane.b32.xlu1 %v1846_v33, %s1990_s23 }
0x1e31   :  { %v1848_v35 = vpop.eup %1847 }
0x1e32   :  { %v1119_v36 = vadd.f32 1.0, %v1848_v35 }
0x1e34   :  { %1849 = vrcp.f32 %v1119_v36  ;;  %v1131_v38 = vand.u32 2147483648, %v1119_v36  ;;  %vm1125_vm12 = vweird.f32 %v1119_v36  ;;  %v1129_v39 = vand.u32 2147483647, %v1119_v36 }
0x1e36   :  { %v1132_v41 = vor.u32 1.1754944e-38, %v1131_v38  ;;  %vm1130_vm14 = vcmp.eq.f32.partialorder %v1129_v39, 8.507059e+37 }
0x1e3a   :  { %v1850_v4 = vpop.eup %1849 }
0x1e3b   :  { %v1121_v47 = vmul.f32 %v1850_v4, %v1119_v36  ;;  %vm1126_vm11 = vweird.f32 %v1850_v4 }
0x1e3c   :  { %vm1127_vm13 = vmor %vm1125_vm12, %vm1126_vm11 }
0x1e3d   :  { %v1122_v6 = vsub.f32 1.0, %v1121_v47 }
0x1e3f   :  { %v1123_v26 = vmul.f32 %v1850_v4, %v1122_v6 }
0x1e41   :  { %v1124_v37 = vadd.f32 %v1850_v4, %v1123_v26 }
0x1e43   :  { %v1128_v40 = vsel %vm1127_vm13, %v1850_v4, %v1124_v37 }
0x1e44   :  { %v1133_v43 = vsel %vm1130_vm14, %v1132_v41, %v1128_v40 }
0x1e45   :  { %v1136_v1 = vmul.f32 %v1133_v43, %v1062_v17 }
0x1ea2   :  { %v1139_v42 = vpop.permute.xlu1 %1138 }
0x1ea3   :  { %v1141_v44 = vmul.f32 %v1139_v42, %v1133_v43 }
0x1ea5   :  { %1143 = vrot.lane.b32.xlu2 %v1141_v44, %s1993_s2 }
0x1eff   :  { %v1144_v45 = vpop.permute.xlu2 %1143 }
0x1f00   :  { %v1146_v46 = vadd.f32 %v1144_v45, %v1136_v1 }
0x1f02   :  { %1851 = vtanh.f32 %v1146_v46 }
0x1f08   :  { %v1852_v48 = vpop.eup %1851 }
0x1f09   :  { %1149 = vrot.lane.b32.xlu0 %v1852_v48, %s1990_s23 }
0x1f7b   :  { %v1150_v51 = vpop.permute.xlu0 %1149 }
0x1f7c   :  { %v1152_v52 = vmul.f32 %v1150_v51, %v1133_v43  ;;  %v1717_v51 = vld [vmem:[#allocation7 + $0x50] sm:$0xff] }
0x1f7d   :  { %1347 = vmatpush.bf16.msra.mxu3 %v1717_v51  ;;  %v1721_v51 = vld [vmem:[#allocation7 + $0x70] sm:$0xff] }
0x1f7e   :  { %v1153_v53 = vpack.c.bf16 %v1152_v52, %v1152_v52 }
0x1f80   :  { %1155 = vrot.lane.b32.xlu1 %v1153_v53, %s1993_s2 }
0x1ff2   :  { %v1156_v54 = vpop.permute.xlu1 %1155 }
0x1ff3   :  { %1658 = vmatmul.msk.bf16.vlgmr.msrb.gmra.mxu3 %vm223_vm6, %v1156_v54  ;;  %1659 = vmatmul.msk.bf16.vlgmr.msra.gmra.mxu0 %vm223_vm6, %v1156_v54 }
0x1ff4   :  { %1514 = vmatpush.bf16.msrb.mxu3 %v1722_v50 }
0x1ff8   :  { %1515 = vmatpush.bf16.msrb.mxu3 %v1721_v51 }
0x2070   :  { %v1195_v56 = vpop.f32.mrf.mxu0 }
0x2071   :  { %v1199_v57 = vadd.f32 %v1195_v56, %v2196_v55 }
0x2073   :  { %1853 = vtanh.f32 %v1199_v57  ;;  %v1660_v63 = vmul.f32 -1.442695, %v1199_v57 }
0x2075   :  { %1855 = vpow2.f32 %v1660_v63 }
0x2076   :  { %v1181_v58 = vpop.f32.mrf.mxu3 }
0x2077   :  { %v1185_v59 = vadd.f32 %v1181_v58, %v1101_v28 }
0x2078   :  { %v1197_v60 = vpop.f32.mrf.mxu0 }
0x2079   :  { %v1854_v61 = vpop.eup %1853 }
0x207a   :  { %1222 = vrot.lane.b32.xlu2 %v1854_v61, %s1990_s23 }
0x207b   :  { %v1856_v0 = vpop.eup %1855 }
0x207c   :  { %v1203_v2 = vadd.f32 1.0, %v1856_v0 }
0x207e   :  { %v1183_v62 = vpop.f32.mrf.mxu3  ;;  %1857 = vrcp.f32 %v1203_v2  ;;  %v1215_v10 = vand.u32 2147483648, %v1203_v2  ;;  %vm1209_vm0 = vweird.f32 %v1203_v2  ;;  %v1213_v11 = vand.u32 2147483647, %v1203_v2 }
0x2080   :  { %v1216_v13 = vor.u32 1.1754944e-38, %v1215_v10  ;;  %vm1214_vm3 = vcmp.eq.f32.partialorder %v1213_v11, 8.507059e+37 }
0x2084   :  { %v1858_v3 = vpop.eup %1857 }
0x2085   :  { %v1205_v5 = vmul.f32 %v1858_v3, %v1203_v2  ;;  %vm1210_vm15 = vweird.f32 %v1858_v3 }
0x2086   :  { %vm1211_vm2 = vmor %vm1209_vm0, %vm1210_vm15 }
0x2087   :  { %v1206_v7 = vsub.f32 1.0, %v1205_v5 }
0x2089   :  { %v1207_v8 = vmul.f32 %v1858_v3, %v1206_v7 }
0x208b   :  { %v1208_v9 = vadd.f32 %v1858_v3, %v1207_v8 }
0x208d   :  { %v1212_v12 = vsel %vm1211_vm2, %v1858_v3, %v1208_v9 }
0x208e   :  { %v1217_v15 = vsel %vm1214_vm3, %v1216_v13, %v1212_v12 }
0x208f   :  { %v1220_v17 = vmul.f32 %v1217_v15, %v1146_v46 }
0x20d4   :  { %v1223_v14 = vpop.permute.xlu2 %1222 }
0x20d5   :  { %v1225_v16 = vmul.f32 %v1223_v14, %v1217_v15 }
0x20d7   :  { %1227 = vrot.lane.b32.xlu0 %v1225_v16, %s1993_s2 }
0x2149   :  { %v1228_v18 = vpop.permute.xlu0 %1227 }
0x214a   :  { %v1230_v19 = vadd.f32 %v1228_v18, %v1220_v17 }
0x214c   :  { %1859 = vtanh.f32 %v1230_v19 }
0x2152   :  { %v1860_v20 = vpop.eup %1859 }
0x2153   :  { %1233 = vrot.lane.b32.xlu1 %v1860_v20, %s1990_s23 }
0x21c5   :  { %v1234_v23 = vpop.permute.xlu1 %1233 }
0x21c6   :  { %v1236_v24 = vmul.f32 %v1234_v23, %v1217_v15  ;;  %v1719_v23 = vld [vmem:[#allocation7 + $0x60] sm:$0xff] }
0x21c7   :  { %1431 = vmatpush.bf16.msrb.mxu1 %v1719_v23 }
0x21c8   :  { %v1237_v25 = vpack.c.bf16 %v1236_v24, %v1236_v24 }
0x21ca   :  { %1239 = vrot.lane.b32.xlu2 %v1237_v25, %s1993_s2 }
0x2224   :  { %v1240_v27 = vpop.permute.xlu2 %1239 }
0x2225   :  { %1669 = vmatmul.msk.bf16.vlgmr.msra.gmra.mxu1 %vm223_vm6, %v1240_v27  ;;  %1670 = vmatmul.msk.bf16.vlgmr.msra.gmra.mxu2 %vm223_vm6, %v1240_v27 }
0x22a2   :  { %v1265_v28 = vpop.f32.mrf.mxu1 }
0x22a3   :  { %v1269_v29 = vadd.f32 %v1265_v28, %v1185_v59 }
0x22a8   :  { %v1279_v30 = vpop.f32.mrf.mxu2 }
0x22a9   :  { %v1283_v31 = vadd.f32 %v1279_v30, %v2196_v55 }
0x22aa   :  { %v1267_v32 = vpop.f32.mrf.mxu1 }
0x22ab   :  { %1861 = vtanh.f32 %v1283_v31  ;;  %v1671_v35 = vmul.f32 -1.442695, %v1283_v31 }
0x22ad   :  { %1863 = vpow2.f32 %v1671_v35 }
0x22b0   :  { %v1281_v33 = vpop.f32.mrf.mxu2 }
0x22b1   :  { %v1862_v34 = vpop.eup %1861 }
0x22b2   :  { %1306 = vrot.lane.b32.xlu0 %v1862_v34, %s1990_s23 }
0x22b3   :  { %v1864_v36 = vpop.eup %1863 }
0x22b4   :  { %v1287_v4 = vadd.f32 1.0, %v1864_v36 }
0x22b6   :  { %1865 = vrcp.f32 %v1287_v4  ;;  %v1299_v39 = vand.u32 2147483648, %v1287_v4  ;;  %vm1293_vm5 = vweird.f32 %v1287_v4  ;;  %v1297_v40 = vand.u32 2147483647, %v1287_v4 }
0x22b8   :  { %v1300_v42 = vor.u32 1.1754944e-38, %v1299_v39  ;;  %vm1298_vm7 = vcmp.eq.f32.partialorder %v1297_v40, 8.507059e+37 }
0x22bc   :  { %v1866_v47 = vpop.eup %1865 }
0x22bd   :  { %v1289_v6 = vmul.f32 %v1866_v47, %v1287_v4  ;;  %vm1294_vm4 = vweird.f32 %v1866_v47 }
0x22be   :  { %vm1295_vm1 = vmor %vm1293_vm5, %vm1294_vm4 }
0x22bf   :  { %v1290_v26 = vsub.f32 1.0, %v1289_v6 }
0x22c1   :  { %v1291_v37 = vmul.f32 %v1866_v47, %v1290_v26 }
0x22c3   :  { %v1292_v38 = vadd.f32 %v1866_v47, %v1291_v37 }
0x22c5   :  { %v1296_v41 = vsel %vm1295_vm1, %v1866_v47, %v1292_v38 }
0x22c6   :  { %v1301_v44 = vsel %vm1298_vm7, %v1300_v42, %v1296_v41 }
0x22c7   :  { %v1304_v45 = vmul.f32 %v1301_v44, %v1230_v19 }
0x2324   :  { %v1307_v43 = vpop.permute.xlu0 %1306 }
0x2325   :  { %v1309_v1 = vmul.f32 %v1307_v43, %v1301_v44 }
0x2327   :  { %1311 = vrot.lane.b32.xlu1 %v1309_v1, %s1993_s2 }
0x2399   :  { %v1312_v46 = vpop.permute.xlu1 %1311 }
0x239a   :  { %v1314_v48 = vadd.f32 %v1312_v46, %v1304_v45 }
0x239c   :  { %1867 = vtanh.f32 %v1314_v48 }
0x23a2   :  { %v1868_v49 = vpop.eup %1867 }
0x23a3   :  { %1317 = vrot.lane.b32.xlu2 %v1868_v49, %s1990_s23 }
0x23fd   :  { %v1318_v52 = vpop.permute.xlu2 %1317 }
0x23fe   :  { %v1320_v53 = vmul.f32 %v1318_v52, %v1301_v44 }
0x2400   :  { %v1321_v54 = vpack.c.bf16 %v1320_v53, %v1320_v53 }
0x2402   :  { %1323 = vrot.lane.b32.xlu0 %v1321_v54, %s1993_s2 }
0x2474   :  { %v1324_v56 = vpop.permute.xlu0 %1323 }
0x2475   :  { %1680 = vmatmul.msk.bf16.vlgmr.msra.gmra.mxu3 %vm223_vm6, %v1324_v56  ;;  %1681 = vmatmul.msk.bf16.vlgmr.msrb.gmra.mxu0 %vm223_vm6, %v1324_v56 }
0x24f2   :  { %v1363_v57 = vpop.f32.mrf.mxu0 }
0x24f3   :  { %v1367_v58 = vadd.f32 %v1363_v57, %v2196_v55  ;;  %v1740_v57 = vld [vmem:[%s2278_s8] ss:$0 sm:$0xff] }
0x24f5   :  { %1869 = vtanh.f32 %v1367_v58  ;;  %v1682_v0 = vmul.f32 -1.442695, %v1367_v58 }
0x24f7   :  { %1871 = vpow2.f32 %v1682_v0 }
0x24f8   :  { %v1349_v59 = vpop.f32.mrf.mxu3 }
0x24f9   :  { %v1353_v60 = vadd.f32 %v1349_v59, %v1269_v29 }
0x24fa   :  { %v1365_v61 = vpop.f32.mrf.mxu0 }
0x24fb   :  { %v1870_v62 = vpop.eup %1869 }
0x24fc   :  { %1390 = vrot.lane.b32.xlu1 %v1870_v62, %s1990_s23 }
0x24fd   :  { %v1872_v2 = vpop.eup %1871 }
0x24fe   :  { %v1371_v3 = vadd.f32 1.0, %v1872_v2 }
0x2500   :  { %v1351_v63 = vpop.f32.mrf.mxu3  ;;  %1873 = vrcp.f32 %v1371_v3  ;;  %v1383_v11 = vand.u32 2147483648, %v1371_v3  ;;  %vm1377_vm9 = vweird.f32 %v1371_v3  ;;  %v1381_v12 = vand.u32 2147483647, %v1371_v3 }
0x2502   :  { %v1384_v14 = vor.u32 1.1754944e-38, %v1383_v11  ;;  %vm1382_vm11 = vcmp.eq.f32.partialorder %v1381_v12, 8.507059e+37 }
0x2506   :  { %v1874_v5 = vpop.eup %1873 }
0x2507   :  { %v1373_v7 = vmul.f32 %v1874_v5, %v1371_v3  ;;  %vm1378_vm8 = vweird.f32 %v1874_v5 }
0x2508   :  { %vm1379_vm10 = vmor %vm1377_vm9, %vm1378_vm8 }
0x2509   :  { %v1374_v8 = vsub.f32 1.0, %v1373_v7 }
0x250b   :  { %v1375_v9 = vmul.f32 %v1874_v5, %v1374_v8 }
0x250d   :  { %v1376_v10 = vadd.f32 %v1874_v5, %v1375_v9 }
0x250f   :  { %v1380_v13 = vsel %vm1379_vm10, %v1874_v5, %v1376_v10 }
0x2510   :  { %v1385_v16 = vsel %vm1382_vm11, %v1384_v14, %v1380_v13 }
0x2511   :  { %v1388_v18 = vmul.f32 %v1385_v16, %v1314_v48 }
0x256e   :  { %v1391_v15 = vpop.permute.xlu1 %1390 }
0x256f   :  { %v1393_v17 = vmul.f32 %v1391_v15, %v1385_v16 }
0x2571   :  { %1395 = vrot.lane.b32.xlu2 %v1393_v17, %s1993_s2 }
0x25cb   :  { %v1396_v19 = vpop.permute.xlu2 %1395 }
0x25cc   :  { %v1398_v20 = vadd.f32 %v1396_v19, %v1388_v18 }
0x25ce   :  { %1875 = vtanh.f32 %v1398_v20 }
0x25d4   :  { %v1876_v21 = vpop.eup %1875 }
0x25d5   :  { %1401 = vrot.lane.b32.xlu0 %v1876_v21, %s1990_s23 }
0x2647   :  { %v1402_v24 = vpop.permute.xlu0 %1401 }
0x2648   :  { %v1404_v25 = vmul.f32 %v1402_v24, %v1385_v16 }
0x264a   :  { %v1405_v27 = vpack.c.bf16 %v1404_v25, %v1404_v25 }
0x264c   :  { %1407 = vrot.lane.b32.xlu1 %v1405_v27, %s1993_s2 }
0x26be   :  { %v1408_v28 = vpop.permute.xlu1 %1407 }
0x26bf   :  { %1691 = vmatmul.msk.bf16.vlgmr.msrb.gmra.mxu1 %vm223_vm6, %v1408_v28  ;;  %1692 = vmatmul.msk.bf16.vlgmr.msrb.gmra.mxu2 %vm223_vm6, %v1408_v28 }
0x273c   :  { %v1433_v29 = vpop.f32.mrf.mxu1 }
0x273d   :  { %v1437_v30 = vadd.f32 %v1433_v29, %v1353_v60 }
0x2742   :  { %v1447_v31 = vpop.f32.mrf.mxu2 }
0x2743   :  { %v1451_v32 = vadd.f32 %v1447_v31, %v2196_v55 }
0x2744   :  { %v1435_v33 = vpop.f32.mrf.mxu1 }
0x2745   :  { %1877 = vtanh.f32 %v1451_v32  ;;  %v1693_v36 = vmul.f32 -1.442695, %v1451_v32 }
0x2747   :  { %1879 = vpow2.f32 %v1693_v36 }
0x274a   :  { %v1449_v34 = vpop.f32.mrf.mxu2 }
0x274b   :  { %v1878_v35 = vpop.eup %1877 }
0x274c   :  { %1474 = vrot.lane.b32.xlu2 %v1878_v35, %s1990_s23 }
0x274d   :  { %v1880_v4 = vpop.eup %1879 }
0x274e   :  { %v1455_v47 = vadd.f32 1.0, %v1880_v4 }
0x2750   :  { %1881 = vrcp.f32 %v1455_v47  ;;  %v1467_v40 = vand.u32 2147483648, %v1455_v47  ;;  %vm1461_vm13 = vweird.f32 %v1455_v47  ;;  %v1465_v55 = vand.u32 2147483647, %v1455_v47 }
0x2752   :  { %v1468_v42 = vor.u32 1.1754944e-38, %v1467_v40  ;;  %vm1466_vm15 = vcmp.eq.f32.partialorder %v1465_v55, 8.507059e+37 }
0x2756   :  { %v1882_v6 = vpop.eup %1881 }
0x2757   :  { %v1457_v26 = vmul.f32 %v1882_v6, %v1455_v47  ;;  %vm1462_vm12 = vweird.f32 %v1882_v6 }
0x2758   :  { %vm1463_vm14 = vmor %vm1461_vm13, %vm1462_vm12 }
0x2759   :  { %v1458_v37 = vsub.f32 1.0, %v1457_v26 }
0x275b   :  { %v1459_v38 = vmul.f32 %v1882_v6, %v1458_v37 }
0x275d   :  { %v1460_v39 = vadd.f32 %v1882_v6, %v1459_v38 }
0x275f   :  { %v1464_v41 = vsel %vm1463_vm14, %v1882_v6, %v1460_v39 }
0x2760   :  { %v1469_v44 = vsel %vm1466_vm15, %v1468_v42, %v1464_v41 }
0x2761   :  { %v1472_v45 = vmul.f32 %v1469_v44, %v1398_v20 }
0x27a6   :  { %v1475_v43 = vpop.permute.xlu2 %1474 }
0x27a7   :  { %v1477_v1 = vmul.f32 %v1475_v43, %v1469_v44 }
0x27a9   :  { %1479 = vrot.lane.b32.xlu0 %v1477_v1, %s1993_s2 }
0x281b   :  { %v1480_v46 = vpop.permute.xlu0 %1479 }
0x281c   :  { %v1482_v48 = vadd.f32 %v1480_v46, %v1472_v45 }
0x281e   :  { %1883 = vtanh.f32 %v1482_v48 }
0x2824   :  { %v1884_v49 = vpop.eup %1883 }
0x2825   :  { %1485 = vrot.lane.b32.xlu1 %v1884_v49, %s1990_s23 }
0x2897   :  { %v1486_v52 = vpop.permute.xlu1 %1485 }
0x2898   :  { %v1488_v53 = vmul.f32 %v1486_v52, %v1469_v44 }
0x289a   :  { %v1489_v54 = vpack.c.bf16 %v1488_v53, %v1488_v53 }
0x289c   :  { %1491 = vrot.lane.b32.xlu2 %v1489_v54, %s1993_s2 }
0x28f6   :  { %v1492_v56 = vpop.permute.xlu2 %1491 }
0x28f7   :  { %1702 = vmatmul.msk.bf16.vlgmr.msrb.gmra.mxu3 %vm223_vm6, %v1492_v56 }
0x297a   :  { %v1517_v58 = vpop.f32.mrf.mxu3 }
0x297b   :  { %v1521_v59 = vadd.f32 %v1517_v58, %v1437_v30 }
0x297d   :  { %v1526_v60 = vadd.f32 %v1740_v57, %v1521_v59 }
0x297f   :  { %1527 = vst [vmem:[#allocation8] sm:$0xff] %v1526_v60 }
0x2980   :  { %1538 = dma.vmem_to_hbm [thread:$0]  %s1534_s1, 128, %s1536_s7, [#allocation4]  }
0x2982   :  { %v1519_v61 = vpop.f32.mrf.mxu3 }
0x2983   :  { %1985 = dma.done.wait [#allocation4], 128  }
0x2984   :  { %1986 = vsyncadd [#allocation4], 4294967168 }
0x2985   :  { %1543 = vsyncpa [#allocation3], 1 }
0x2986   :  { %1544 = vsyncpa [#allocation6], 1 }
0x2987   :  { %1545 = vsyncpa [#allocation4], 1 }

</bundles_post_ra>
